<compile_context>
chip_gen: v6e
topology: v6e:2x2x1
jax: 0.10.0
libtpu: 0.0.40
codegen_flags: <defaults>
</compile_context>

<pallas_src>
import functools

import jax
import jax.numpy as jnp
from jax import lax
from jax.experimental import pallas as pl
from jax.experimental.pallas import tpu as pltpu


def _round_up(x, m):
    return (x + m - 1) // m * m


# ----------------------------------------------------------------------------
# Kernel 1: item encoder hot path.
#   out = gathered_fused_emb + icontext @ Wc     (rows = collapsed B*S)
# ----------------------------------------------------------------------------
def _encoder_kernel(gath_ref, ctx_ref, wc_ref, out_ref):
    ctx = ctx_ref[...].astype(jnp.bfloat16)           # bf16 MXU operand
    out_ref[...] = gath_ref[...] + jnp.dot(
        ctx, wc_ref[...], preferred_element_type=jnp.float32)


def encode_pallas(tokens, icontexts, fused_emb, wc_bf16, *, row_tile=512):
    """AdvancedItemEncoder: gather of prefused table (glue) + Wc matmul (Pallas)."""
    B, S = tokens.shape
    H = fused_emb.shape[1]
    C = icontexts.shape[2]
    R = B * S

    gathered = jnp.take(fused_emb, tokens.reshape(R), axis=0)     # (R, H)  glue
    ctx = icontexts.reshape(R, C).astype(jnp.float32)             # (R, C)

    rt = min(row_tile, _round_up(R, 8))
    R_pad = _round_up(R, rt)
    if R_pad != R:
        gathered = jnp.pad(gathered, ((0, R_pad - R), (0, 0)))
        ctx = jnp.pad(ctx, ((0, R_pad - R), (0, 0)))

    out = pl.pallas_call(
        _encoder_kernel,
        out_shape=jax.ShapeDtypeStruct((R_pad, H), jnp.float32),
        grid=(R_pad // rt,),
        in_specs=[
            pl.BlockSpec((rt, H), lambda i: (i, 0)),
            pl.BlockSpec((rt, C), lambda i: (i, 0)),
            pl.BlockSpec((C, H), lambda i: (0, 0)),
        ],
        out_specs=pl.BlockSpec((rt, H), lambda i: (i, 0)),
        compiler_params=pltpu.CompilerParams(dimension_semantics=("parallel",)),
    )(gathered, ctx, wc_bf16)
    return out[:R].reshape(B, S, H)


# ----------------------------------------------------------------------------
# Kernel 2: batched GRU recurrence + L2-normalize + extract scoring.
#   Each grid step processes a (B_TILE, ...) batch tile; the time recurrence is
#   a fori_loop with a (B_TILE, H) f32 hidden state (full MXU tiles).
#   logits[b, t] = <normalize(E[b, t]), normalize(GRU(P[b])[-1])>
# ----------------------------------------------------------------------------
def _gru_logits_kernel(p_ref, e_ref, wih_ref, whh_ref, bih_ref, bhh_ref,
                       logits_ref, gi_r_ref, gi_z_ref, gi_n_ref, *, unroll):
    S, B_TILE, H = p_ref.shape            # p is fed time-major: (S, B_TILE, H)

    # --- Precompute input-gate projections for ALL timesteps in one big matmul,
    #     stored time-major per gate so the loop reads contiguous slabs. ---
    p_flat = p_ref[...].reshape(S * B_TILE, H).astype(jnp.bfloat16)
    gi_r_ref[...] = jnp.dot(p_flat, wih_ref[0],
                            preferred_element_type=jnp.float32) + bih_ref[0]
    gi_z_ref[...] = jnp.dot(p_flat, wih_ref[1],
                            preferred_element_type=jnp.float32) + bih_ref[1]
    gi_n_ref[...] = jnp.dot(p_flat, wih_ref[2],
                            preferred_element_type=jnp.float32) + bih_ref[2]

    # Hoist recurrent weights / biases out of the serial loop.
    whh_r = whh_ref[0]
    whh_z = whh_ref[1]
    whh_n = whh_ref[2]
    bhh_r = bhh_ref[0]
    bhh_z = bhh_ref[1]
    bhh_n = bhh_ref[2]

    def step(t, h):                                   # h: (B_TILE, H) f32
        idx = pl.multiple_of(t * B_TILE, B_TILE)
        h_bf = h.astype(jnp.bfloat16)                 # bf16 only into the MXU
        gh_r = jnp.dot(h_bf, whh_r, preferred_element_type=jnp.float32) + bhh_r
        gh_z = jnp.dot(h_bf, whh_z, preferred_element_type=jnp.float32) + bhh_z
        gh_n = jnp.dot(h_bf, whh_n, preferred_element_type=jnp.float32) + bhh_n
        gi_r = gi_r_ref[pl.ds(idx, B_TILE), :]
        gi_z = gi_z_ref[pl.ds(idx, B_TILE), :]
        gi_n = gi_n_ref[pl.ds(idx, B_TILE), :]
        r = jax.nn.sigmoid(gi_r + gh_r)               # gate math stays f32
        z = jax.nn.sigmoid(gi_z + gh_z)
        n = jnp.tanh(gi_n + r * gh_n)
        return (1.0 - z) * n + z * h

    h = lax.fori_loop(0, S, step, jnp.zeros((B_TILE, H), jnp.float32),
                      unroll=unroll)

    # F.normalize(p=2): x * rsqrt(max(sum(x^2), eps^2)) — rsqrt runs on the EUP.
    h_norm = h * lax.rsqrt(
        jnp.maximum(jnp.sum(h * h, axis=-1, keepdims=True), 1e-24))
    e = e_ref[...]                                    # (B_TILE, T, H) f32
    e_norm = e * lax.rsqrt(
        jnp.maximum(jnp.sum(e * e, axis=-1, keepdims=True), 1e-24))

    # Lane-dense (B_TILE, T) output: broadcast-multiply + lane reduction.
    logits_ref[...] = jnp.sum(e_norm * h_norm[:, None, :], axis=-1)


def gru_logits_pallas(P, E, params, *, batch_tile=128):
    B, S, H = P.shape
    T = E.shape[1]

    bt = min(batch_tile, _round_up(B, 8))
    B_pad = _round_up(B, bt)
    if B_pad != B:
        P = jnp.pad(P, ((0, B_pad - B), (0, 0), (0, 0)))
        E = jnp.pad(E, ((0, B_pad - B), (0, 0), (0, 0)))

    P_t = jnp.transpose(P, (1, 0, 2))                 # time-major (S, B_pad, H) glue

    wih_bf = params["wih_s"].astype(jnp.bfloat16)     # halve weight DMA bytes
    whh_bf = params["whh_s"].astype(jnp.bfloat16)

    kernel = functools.partial(_gru_logits_kernel, unroll=bool(S <= 32))

    out = pl.pallas_call(
        kernel,
        out_shape=jax.ShapeDtypeStruct((B_pad, T), jnp.float32),
        grid=(B_pad // bt,),
        in_specs=[
            pl.BlockSpec((S, bt, H), lambda b: (0, b, 0)),      # P (time-major)
            pl.BlockSpec((bt, T, H), lambda b: (b, 0, 0)),      # E
            pl.BlockSpec((3, H, H), lambda b: (0, 0, 0)),       # W_ih (r,z,n)
            pl.BlockSpec((3, H, H), lambda b: (0, 0, 0)),       # W_hh (r,z,n)
            pl.BlockSpec((3, 1, H), lambda b: (0, 0, 0)),       # b_ih
            pl.BlockSpec((3, 1, H), lambda b: (0, 0, 0)),       # b_hh
        ],
        out_specs=pl.BlockSpec((bt, T), lambda b: (b, 0)),      # lane-dense logits
        scratch_shapes=[pltpu.VMEM((S * bt, H), jnp.float32)] * 3,
        compiler_params=pltpu.CompilerParams(dimension_semantics=("parallel",)),
    )(P_t, E, wih_bf, whh_bf, params["bih_s"], params["bhh_s"])
    return out[:B]


# ----------------------------------------------------------------------------
# Full forward
# ----------------------------------------------------------------------------
@jax.jit
def gru4recpp_forward(profile_tokens, profile_icontexts,
                      extract_tokens, extract_icontexts, params):
    # Fold token-only encoder terms into one prefused table (param-only work;
    # in a serving path this is hoisted once per checkpoint).
    fused_emb = (params["item_emb"]
                 + params["ifeatures"] @ params["wf_t"]
                 + params["b_enc"])
    wc_bf = params["wc_t"].astype(jnp.bfloat16)

    P = encode_pallas(profile_tokens, profile_icontexts, fused_emb, wc_bf)
    E = encode_pallas(extract_tokens, extract_icontexts, fused_emb, wc_bf)
    return gru_logits_pallas(P, E, params)


# ----------------------------------------------------------------------------
# Pure-JAX f32 reference (correctness check)
# ----------------------------------------------------------------------------
def reference_forward(profile_tokens, profile_icontexts,
                      extract_tokens, extract_icontexts, params):
    def encode(tokens, ctx):
        emb = params["item_emb"][tokens]
        feat = params["ifeatures"][tokens]
        return emb + feat @ params["wf_t"] + ctx @ params["wc_t"] + params["b_enc"]

    P = encode(profile_tokens, profile_icontexts)
    E = encode(extract_tokens, extract_icontexts)
    E = E / jnp.maximum(jnp.linalg.norm(E, axis=2, keepdims=True), 1e-12)

    wih, whh = params["wih_s"], params["whh_s"]
    bih, bhh = params["bih_s"], params["bhh_s"]
    B, S, H = P.shape
    h = jnp.zeros((B, H), jnp.float32)
    for t in range(S):
        x = P[:, t]
        r = jax.nn.sigmoid(x @ wih[0] + bih[0] + h @ whh[0] + bhh[0])
        z = jax.nn.sigmoid(x @ wih[1] + bih[1] + h @ whh[1] + bhh[1])
        n = jnp.tanh(x @ wih[2] + bih[2] + r * (h @ whh[2] + bhh[2]))
        h = (1.0 - z) * n + z * h
    h = h / jnp.maximum(jnp.linalg.norm(h, axis=1, keepdims=True), 1e-12)
    return jnp.einsum("btd,bd->bt", E, h)


# ----------------------------------------------------------------------------
# Deterministic parameters / inputs and smoke test
# ----------------------------------------------------------------------------
def make_params(key, num_items, ifeature_dim, icontext_dim, hidden_dim):
    ks = jax.random.split(key, 9)
    s = 0.1
    H, F, C = hidden_dim, ifeature_dim, icontext_dim
    return {
        "item_emb": s * jax.random.normal(ks[0], (num_items + 1, H), jnp.float32),
        "ifeatures": s * jax.random.normal(ks[1], (num_items + 1, F), jnp.float32),
        "wf_t": s * jax.random.normal(ks[2], (F, H), jnp.float32),
        "wc_t": s * jax.random.normal(ks[3], (C, H), jnp.float32),
        "b_enc": s * jax.random.normal(ks[4], (1, H), jnp.float32),
        # GRU weights stacked per gate (order r, z, n), transposed so x @ W.
        # Equivalent to PyTorch weight_ih_l0 (3H, H) / weight_hh_l0 / biases.
        "wih_s": s * jax.random.normal(ks[5], (3, H, H), jnp.float32),
        "whh_s": s * jax.random.normal(ks[6], (3, H, H), jnp.float32),
        "bih_s": s * jax.random.normal(ks[7], (3, 1, H), jnp.float32),
        "bhh_s": s * jax.random.normal(ks[8], (3, 1, H), jnp.float32),
    }


if __name__ == "__main__":
    B, S, T = 2, 8, 8
    num_items, ifeature_dim, icontext_dim, hidden_dim = 50, 8, 4, 32

    key = jax.random.PRNGKey(0)
    kp, kt1, kt2, kc1, kc2 = jax.random.split(key, 5)

    params = make_params(kp, num_items, ifeature_dim, icontext_dim, hidden_dim)

    profile_tokens = jax.random.randint(kt1, (B, S), 1, num_items + 1, jnp.int32)
    extract_tokens = jax.random.randint(kt2, (B, T), 1, num_items + 1, jnp.int32)
    profile_icontexts = jax.random.normal(kc1, (B, S, icontext_dim), jnp.float32)
    extract_icontexts = jax.random.normal(kc2, (B, T, icontext_dim), jnp.float32)

    logits = gru4recpp_forward(profile_tokens, profile_icontexts,
                               extract_tokens, extract_icontexts, params)
    logits = jax.block_until_ready(logits)

    ref = reference_forward(profile_tokens, profile_icontexts,
                            extract_tokens, extract_icontexts, params)
    assert logits.shape == (B, T), logits.shape
    # bf16 MXU operands (f32 accumulation) drift ~1e-3 vs the pure-f32 reference.
    assert jnp.allclose(logits, ref, atol=3e-2, rtol=3e-2), (
        float(jnp.max(jnp.abs(logits - ref))), logits, ref)

    print("KERNEL_OK")
</pallas_src>

<mosaic_0001>
module attributes {stable_mosaic.version = 11 : i64} {
  func.func @_encoder_kernel(%arg0: i32, %arg1: memref<16x32xf32, #tpu.memory_space<vmem>>, %arg2: memref<16x4xf32, #tpu.memory_space<vmem>>, %arg3: memref<4x32xbf16, #tpu.memory_space<vmem>>, %arg4: memref<16x32xf32, #tpu.memory_space<vmem>>) attributes {dimension_semantics = [#tpu.dimension_semantics<parallel>], iteration_bounds = array<i64: 1>, scalar_prefetch = 0 : i64, scratch_operands = 0 : i64, tpu.core_type = #tpu.core_type<tc>, window_params = [{transform_indices = @transform_0, window_bounds = array<i64: 16, 32>}, {transform_indices = @transform_1, window_bounds = array<i64: 16, 4>}, {pipeline_mode = #tpu.pipeline_mode<synchronous>, transform_indices = @transform_2, window_bounds = array<i64: 4, 32>}, {transform_indices = @transform_3, window_bounds = array<i64: 16, 32>}]} {
    %c0 = arith.constant 0 : index
    %c0_0 = arith.constant 0 : index
    %0 = vector.load %arg2[%c0, %c0_0] : memref<16x4xf32, #tpu.memory_space<vmem>>, vector<16x4xf32>
    %1 = arith.truncf %0 : vector<16x4xf32> to vector<16x4xbf16>
    %c0_1 = arith.constant 0 : index
    %c0_2 = arith.constant 0 : index
    %2 = vector.load %arg1[%c0_1, %c0_2] : memref<16x32xf32, #tpu.memory_space<vmem>>, vector<16x32xf32>
    %c0_3 = arith.constant 0 : index
    %c0_4 = arith.constant 0 : index
    %3 = vector.load %arg3[%c0_3, %c0_4] : memref<4x32xbf16, #tpu.memory_space<vmem>>, vector<4x32xbf16>
    %cst = arith.constant dense<0.000000e+00> : vector<16x32xf32>
    %4 = tpu.matmul %1, %3, %cst {dimension_numbers = #tpu.dot_dimension_numbers<[1], [0], [0], [1], [0, 0, 1, 1], [], []>} : vector<16x4xbf16>, vector<4x32xbf16>, vector<16x32xf32> -> vector<16x32xf32>
    %5 = arith.addf %2, %4 : vector<16x32xf32>
    %c0_5 = arith.constant 0 : index
    %c0_6 = arith.constant 0 : index
    %6 = vector.load %arg4[%c0_5, %c0_6] : memref<16x32xf32, #tpu.memory_space<vmem>>, vector<16x32xf32>
    tpu.vector_store %arg4[%c0_5, %c0_6], %5 {strides = array<i32>} : memref<16x32xf32, #tpu.memory_space<vmem>>, vector<16x32xf32>,
    return
  }
  func.func @transform_0(%arg0: i32) -> (i32, i32) {
    %c0_i32 = arith.constant 0 : i32
    %c0_i32_0 = arith.constant 0 : i32
    return %arg0, %c0_i32 : i32, i32
  }
  func.func @transform_1(%arg0: i32) -> (i32, i32) {
    %c0_i32 = arith.constant 0 : i32
    %c0_i32_0 = arith.constant 0 : i32
    return %arg0, %c0_i32 : i32, i32
  }
  func.func @transform_2(%arg0: i32) -> (i32, i32) {
    %c0_i32 = arith.constant 0 : i32
    %c0_i32_0 = arith.constant 0 : i32
    %c0_i32_1 = arith.constant 0 : i32
    return %c0_i32, %c0_i32_0 : i32, i32
  }
  func.func @transform_3(%arg0: i32) -> (i32, i32) {
    %c0_i32 = arith.constant 0 : i32
    %c0_i32_0 = arith.constant 0 : i32
    return %arg0, %c0_i32 : i32, i32
  }
}

module attributes {stable_mosaic.version = 11 : i64} {
  func.func @_gru_logits_kernel(%arg0: i32, %arg1: memref<8x8x32xf32, #tpu.memory_space<vmem>>, %arg2: memref<8x8x32xf32, #tpu.memory_space<vmem>>, %arg3: memref<3x32x32xbf16, #tpu.memory_space<vmem>>, %arg4: memref<3x32x32xbf16, #tpu.memory_space<vmem>>, %arg5: memref<3x1x32xf32, #tpu.memory_space<vmem>>, %arg6: memref<3x1x32xf32, #tpu.memory_space<vmem>>, %arg7: memref<8x8xf32, #tpu.memory_space<vmem>>, %arg8: memref<64x32xf32, #tpu.memory_space<vmem>>, %arg9: memref<64x32xf32, #tpu.memory_space<vmem>>, %arg10: memref<64x32xf32, #tpu.memory_space<vmem>>) attributes {dimension_semantics = [#tpu.dimension_semantics<parallel>], iteration_bounds = array<i64: 1>, scalar_prefetch = 0 : i64, scratch_operands = 3 : i64, tpu.core_type = #tpu.core_type<tc>, window_params = [{transform_indices = @transform_0, window_bounds = array<i64: 8, 8, 32>}, {transform_indices = @transform_1, window_bounds = array<i64: 8, 8, 32>}, {pipeline_mode = #tpu.pipeline_mode<synchronous>, transform_indices = @transform_2, window_bounds = array<i64: 3, 32, 32>}, {pipeline_mode = #tpu.pipeline_mode<synchronous>, transform_indices = @transform_3, window_bounds = array<i64: 3, 32, 32>}, {pipeline_mode = #tpu.pipeline_mode<synchronous>, transform_indices = @transform_4, window_bounds = array<i64: 3, 1, 32>}, {pipeline_mode = #tpu.pipeline_mode<synchronous>, transform_indices = @transform_5, window_bounds = array<i64: 3, 1, 32>}, {transform_indices = @transform_6, window_bounds = array<i64: 8, 8>}]} {
    %c0 = arith.constant 0 : index
    %c0_0 = arith.constant 0 : index
    %c0_1 = arith.constant 0 : index
    %0 = vector.load %arg1[%c0, %c0_0, %c0_1] : memref<8x8x32xf32, #tpu.memory_space<vmem>>, vector<8x8x32xf32>
    %1 = vector.shape_cast %0 : vector<8x8x32xf32> to vector<64x32xf32>
    %2 = arith.truncf %1 : vector<64x32xf32> to vector<64x32xbf16>
    %c0_2 = arith.constant 0 : index
    %c0_3 = arith.constant 0 : index
    %c0_4 = arith.constant 0 : index
    %3 = vector.load %arg3[%c0_2, %c0_3, %c0_4] : memref<3x32x32xbf16, #tpu.memory_space<vmem>>, vector<1x32x32xbf16>
    %4 = vector.shape_cast %3 : vector<1x32x32xbf16> to vector<32x32xbf16>
    %cst = arith.constant dense<0.000000e+00> : vector<64x32xf32>
    %5 = tpu.matmul %2, %4, %cst {dimension_numbers = #tpu.dot_dimension_numbers<[1], [0], [0], [1], [0, 0, 1, 1], [], []>} : vector<64x32xbf16>, vector<32x32xbf16>, vector<64x32xf32> -> vector<64x32xf32>
    %c0_5 = arith.constant 0 : index
    %c0_6 = arith.constant 0 : index
    %c0_7 = arith.constant 0 : index
    %6 = vector.load %arg5[%c0_5, %c0_6, %c0_7] : memref<3x1x32xf32, #tpu.memory_space<vmem>>, vector<1x1x32xf32>
    %7 = vector.shape_cast %6 : vector<1x1x32xf32> to vector<1x32xf32>
    %8 = vector.broadcast %7 : vector<1x32xf32> to vector<64x32xf32>
    %9 = arith.addf %5, %8 : vector<64x32xf32>
    %c0_8 = arith.constant 0 : index
    %c0_9 = arith.constant 0 : index
    %10 = vector.load %arg8[%c0_8, %c0_9] : memref<64x32xf32, #tpu.memory_space<vmem>>, vector<64x32xf32>
    tpu.vector_store %arg8[%c0_8, %c0_9], %9 {strides = array<i32>} : memref<64x32xf32, #tpu.memory_space<vmem>>, vector<64x32xf32>,
    %c1 = arith.constant 1 : index
    %c0_10 = arith.constant 0 : index
    %c0_11 = arith.constant 0 : index
    %11 = vector.load %arg3[%c1, %c0_10, %c0_11] : memref<3x32x32xbf16, #tpu.memory_space<vmem>>, vector<1x32x32xbf16>
    %12 = vector.shape_cast %11 : vector<1x32x32xbf16> to vector<32x32xbf16>
    %cst_12 = arith.constant dense<0.000000e+00> : vector<64x32xf32>
    %13 = tpu.matmul %2, %12, %cst_12 {dimension_numbers = #tpu.dot_dimension_numbers<[1], [0], [0], [1], [0, 0, 1, 1], [], []>} : vector<64x32xbf16>, vector<32x32xbf16>, vector<64x32xf32> -> vector<64x32xf32>
    %c1_13 = arith.constant 1 : index
    %c0_14 = arith.constant 0 : index
    %c0_15 = arith.constant 0 : index
    %14 = vector.load %arg5[%c1_13, %c0_14, %c0_15] : memref<3x1x32xf32, #tpu.memory_space<vmem>>, vector<1x1x32xf32>
    %15 = vector.shape_cast %14 : vector<1x1x32xf32> to vector<1x32xf32>
    %16 = vector.broadcast %15 : vector<1x32xf32> to vector<64x32xf32>
    %17 = arith.addf %13, %16 : vector<64x32xf32>
    %c0_16 = arith.constant 0 : index
    %c0_17 = arith.constant 0 : index
    %18 = vector.load %arg9[%c0_16, %c0_17] : memref<64x32xf32, #tpu.memory_space<vmem>>, vector<64x32xf32>
    tpu.vector_store %arg9[%c0_16, %c0_17], %17 {strides = array<i32>} : memref<64x32xf32, #tpu.memory_space<vmem>>, vector<64x32xf32>,
    %c2 = arith.constant 2 : index
    %c0_18 = arith.constant 0 : index
    %c0_19 = arith.constant 0 : index
    %19 = vector.load %arg3[%c2, %c0_18, %c0_19] : memref<3x32x32xbf16, #tpu.memory_space<vmem>>, vector<1x32x32xbf16>
    %20 = vector.shape_cast %19 : vector<1x32x32xbf16> to vector<32x32xbf16>
    %cst_20 = arith.constant dense<0.000000e+00> : vector<64x32xf32>
    %21 = tpu.matmul %2, %20, %cst_20 {dimension_numbers = #tpu.dot_dimension_numbers<[1], [0], [0], [1], [0, 0, 1, 1], [], []>} : vector<64x32xbf16>, vector<32x32xbf16>, vector<64x32xf32> -> vector<64x32xf32>
    %c2_21 = arith.constant 2 : index
    %c0_22 = arith.constant 0 : index
    %c0_23 = arith.constant 0 : index
    %22 = vector.load %arg5[%c2_21, %c0_22, %c0_23] : memref<3x1x32xf32, #tpu.memory_space<vmem>>, vector<1x1x32xf32>
    %23 = vector.shape_cast %22 : vector<1x1x32xf32> to vector<1x32xf32>
    %24 = vector.broadcast %23 : vector<1x32xf32> to vector<64x32xf32>
    %25 = arith.addf %21, %24 : vector<64x32xf32>
    %c0_24 = arith.constant 0 : index
    %c0_25 = arith.constant 0 : index
    %26 = vector.load %arg10[%c0_24, %c0_25] : memref<64x32xf32, #tpu.memory_space<vmem>>, vector<64x32xf32>
    tpu.vector_store %arg10[%c0_24, %c0_25], %25 {strides = array<i32>} : memref<64x32xf32, #tpu.memory_space<vmem>>, vector<64x32xf32>,
    %c0_26 = arith.constant 0 : index
    %c0_27 = arith.constant 0 : index
    %c0_28 = arith.constant 0 : index
    %27 = vector.load %arg4[%c0_26, %c0_27, %c0_28] : memref<3x32x32xbf16, #tpu.memory_space<vmem>>, vector<1x32x32xbf16>
    %28 = vector.shape_cast %27 : vector<1x32x32xbf16> to vector<32x32xbf16>
    %c1_29 = arith.constant 1 : index
    %c0_30 = arith.constant 0 : index
    %c0_31 = arith.constant 0 : index
    %29 = vector.load %arg4[%c1_29, %c0_30, %c0_31] : memref<3x32x32xbf16, #tpu.memory_space<vmem>>, vector<1x32x32xbf16>
    %30 = vector.shape_cast %29 : vector<1x32x32xbf16> to vector<32x32xbf16>
    %c2_32 = arith.constant 2 : index
    %c0_33 = arith.constant 0 : index
    %c0_34 = arith.constant 0 : index
    %31 = vector.load %arg4[%c2_32, %c0_33, %c0_34] : memref<3x32x32xbf16, #tpu.memory_space<vmem>>, vector<1x32x32xbf16>
    %32 = vector.shape_cast %31 : vector<1x32x32xbf16> to vector<32x32xbf16>
    %c0_35 = arith.constant 0 : index
    %c0_36 = arith.constant 0 : index
    %c0_37 = arith.constant 0 : index
    %33 = vector.load %arg6[%c0_35, %c0_36, %c0_37] : memref<3x1x32xf32, #tpu.memory_space<vmem>>, vector<1x1x32xf32>
    %34 = vector.shape_cast %33 : vector<1x1x32xf32> to vector<1x32xf32>
    %c1_38 = arith.constant 1 : index
    %c0_39 = arith.constant 0 : index
    %c0_40 = arith.constant 0 : index
    %35 = vector.load %arg6[%c1_38, %c0_39, %c0_40] : memref<3x1x32xf32, #tpu.memory_space<vmem>>, vector<1x1x32xf32>
    %36 = vector.shape_cast %35 : vector<1x1x32xf32> to vector<1x32xf32>
    %c2_41 = arith.constant 2 : index
    %c0_42 = arith.constant 0 : index
    %c0_43 = arith.constant 0 : index
    %37 = vector.load %arg6[%c2_41, %c0_42, %c0_43] : memref<3x1x32xf32, #tpu.memory_space<vmem>>, vector<1x1x32xf32>
    %38 = vector.shape_cast %37 : vector<1x1x32xf32> to vector<1x32xf32>
    %cst_44 = arith.constant 0.000000e+00 : f32
    %39 = vector.broadcast %cst_44 : f32 to vector<8x32xf32>
    %c0_i32 = arith.constant 0 : i32
    %c8_i32 = arith.constant 8 : i32
    %40 = arith.muli %c0_i32, %c8_i32 : i32
    %41 = tpu.assume_multiple %40, 8 : i32
    %42 = arith.truncf %39 : vector<8x32xf32> to vector<8x32xbf16>
    %cst_45 = arith.constant dense<0.000000e+00> : vector<8x32xf32>
    %43 = tpu.matmul %42, %28, %cst_45 {dimension_numbers = #tpu.dot_dimension_numbers<[1], [0], [0], [1], [0, 0, 1, 1], [], []>} : vector<8x32xbf16>, vector<32x32xbf16>, vector<8x32xf32> -> vector<8x32xf32>
    %44 = vector.broadcast %34 : vector<1x32xf32> to vector<8x32xf32>
    %45 = arith.addf %43, %44 : vector<8x32xf32>
    %cst_46 = arith.constant dense<0.000000e+00> : vector<8x32xf32>
    %46 = tpu.matmul %42, %30, %cst_46 {dimension_numbers = #tpu.dot_dimension_numbers<[1], [0], [0], [1], [0, 0, 1, 1], [], []>} : vector<8x32xbf16>, vector<32x32xbf16>, vector<8x32xf32> -> vector<8x32xf32>
    %47 = vector.broadcast %36 : vector<1x32xf32> to vector<8x32xf32>
    %48 = arith.addf %46, %47 : vector<8x32xf32>
    %cst_47 = arith.constant dense<0.000000e+00> : vector<8x32xf32>
    %49 = tpu.matmul %42, %32, %cst_47 {dimension_numbers = #tpu.dot_dimension_numbers<[1], [0], [0], [1], [0, 0, 1, 1], [], []>} : vector<8x32xbf16>, vector<32x32xbf16>, vector<8x32xf32> -> vector<8x32xf32>
    %50 = vector.broadcast %38 : vector<1x32xf32> to vector<8x32xf32>
    %51 = arith.addf %49, %50 : vector<8x32xf32>
    %52 = arith.index_cast %41 : i32 to index
    %c0_48 = arith.constant 0 : index
    %53 = vector.load %arg8[%52, %c0_48] : memref<64x32xf32, #tpu.memory_space<vmem>>, vector<8x32xf32>
    %54 = arith.index_cast %41 : i32 to index
    %c0_49 = arith.constant 0 : index
    %55 = vector.load %arg9[%54, %c0_49] : memref<64x32xf32, #tpu.memory_space<vmem>>, vector<8x32xf32>
    %56 = arith.index_cast %41 : i32 to index
    %c0_50 = arith.constant 0 : index
    %57 = vector.load %arg10[%56, %c0_50] : memref<64x32xf32, #tpu.memory_space<vmem>>, vector<8x32xf32>
    %58 = arith.addf %53, %45 : vector<8x32xf32>
    %59 = arith.negf %58 : vector<8x32xf32>
    %60 = math.exp %59 : vector<8x32xf32>
    %cst_51 = arith.constant 1.000000e+00 : f32
    %61 = vector.broadcast %cst_51 : f32 to vector<8x32xf32>
    %62 = arith.addf %61, %60 : vector<8x32xf32>
    %63 = arith.divf %61, %62 : vector<8x32xf32>
    %64 = arith.addf %55, %48 : vector<8x32xf32>
    %65 = arith.negf %64 : vector<8x32xf32>
    %66 = math.exp %65 : vector<8x32xf32>
    %cst_52 = arith.constant 1.000000e+00 : f32
    %67 = vector.broadcast %cst_52 : f32 to vector<8x32xf32>
    %68 = arith.addf %67, %66 : vector<8x32xf32>
    %69 = arith.divf %67, %68 : vector<8x32xf32>
    %70 = arith.mulf %63, %51 : vector<8x32xf32>
    %71 = arith.addf %57, %70 : vector<8x32xf32>
    %72 = math.tanh %71 : vector<8x32xf32>
    %cst_53 = arith.constant 1.000000e+00 : f32
    %73 = vector.broadcast %cst_53 : f32 to vector<8x32xf32>
    %74 = arith.subf %73, %69 : vector<8x32xf32>
    %75 = arith.mulf %74, %72 : vector<8x32xf32>
    %76 = arith.mulf %69, %39 : vector<8x32xf32>
    %77 = arith.addf %75, %76 : vector<8x32xf32>
    %c1_i32 = arith.constant 1 : i32
    %c8_i32_54 = arith.constant 8 : i32
    %78 = arith.muli %c1_i32, %c8_i32_54 : i32
    %79 = tpu.assume_multiple %78, 8 : i32
    %80 = arith.truncf %77 : vector<8x32xf32> to vector<8x32xbf16>
    %cst_55 = arith.constant dense<0.000000e+00> : vector<8x32xf32>
    %81 = tpu.matmul %80, %28, %cst_55 {dimension_numbers = #tpu.dot_dimension_numbers<[1], [0], [0], [1], [0, 0, 1, 1], [], []>} : vector<8x32xbf16>, vector<32x32xbf16>, vector<8x32xf32> -> vector<8x32xf32>
    %82 = vector.broadcast %34 : vector<1x32xf32> to vector<8x32xf32>
    %83 = arith.addf %81, %82 : vector<8x32xf32>
    %cst_56 = arith.constant dense<0.000000e+00> : vector<8x32xf32>
    %84 = tpu.matmul %80, %30, %cst_56 {dimension_numbers = #tpu.dot_dimension_numbers<[1], [0], [0], [1], [0, 0, 1, 1], [], []>} : vector<8x32xbf16>, vector<32x32xbf16>, vector<8x32xf32> -> vector<8x32xf32>
    %85 = vector.broadcast %36 : vector<1x32xf32> to vector<8x32xf32>
    %86 = arith.addf %84, %85 : vector<8x32xf32>
    %cst_57 = arith.constant dense<0.000000e+00> : vector<8x32xf32>
    %87 = tpu.matmul %80, %32, %cst_57 {dimension_numbers = #tpu.dot_dimension_numbers<[1], [0], [0], [1], [0, 0, 1, 1], [], []>} : vector<8x32xbf16>, vector<32x32xbf16>, vector<8x32xf32> -> vector<8x32xf32>
    %88 = vector.broadcast %38 : vector<1x32xf32> to vector<8x32xf32>
    %89 = arith.addf %87, %88 : vector<8x32xf32>
    %90 = arith.index_cast %79 : i32 to index
    %c0_58 = arith.constant 0 : index
    %91 = vector.load %arg8[%90, %c0_58] : memref<64x32xf32, #tpu.memory_space<vmem>>, vector<8x32xf32>
    %92 = arith.index_cast %79 : i32 to index
    %c0_59 = arith.constant 0 : index
    %93 = vector.load %arg9[%92, %c0_59] : memref<64x32xf32, #tpu.memory_space<vmem>>, vector<8x32xf32>
    %94 = arith.index_cast %79 : i32 to index
    %c0_60 = arith.constant 0 : index
    %95 = vector.load %arg10[%94, %c0_60] : memref<64x32xf32, #tpu.memory_space<vmem>>, vector<8x32xf32>
    %96 = arith.addf %91, %83 : vector<8x32xf32>
    %97 = arith.negf %96 : vector<8x32xf32>
    %98 = math.exp %97 : vector<8x32xf32>
    %cst_61 = arith.constant 1.000000e+00 : f32
    %99 = vector.broadcast %cst_61 : f32 to vector<8x32xf32>
    %100 = arith.addf %99, %98 : vector<8x32xf32>
    %101 = arith.divf %99, %100 : vector<8x32xf32>
    %102 = arith.addf %93, %86 : vector<8x32xf32>
    %103 = arith.negf %102 : vector<8x32xf32>
    %104 = math.exp %103 : vector<8x32xf32>
    %cst_62 = arith.constant 1.000000e+00 : f32
    %105 = vector.broadcast %cst_62 : f32 to vector<8x32xf32>
    %106 = arith.addf %105, %104 : vector<8x32xf32>
    %107 = arith.divf %105, %106 : vector<8x32xf32>
    %108 = arith.mulf %101, %89 : vector<8x32xf32>
    %109 = arith.addf %95, %108 : vector<8x32xf32>
    %110 = math.tanh %109 : vector<8x32xf32>
    %cst_63 = arith.constant 1.000000e+00 : f32
    %111 = vector.broadcast %cst_63 : f32 to vector<8x32xf32>
    %112 = arith.subf %111, %107 : vector<8x32xf32>
    %113 = arith.mulf %112, %110 : vector<8x32xf32>
    %114 = arith.mulf %107, %77 : vector<8x32xf32>
    %115 = arith.addf %113, %114 : vector<8x32xf32>
    %c2_i32 = arith.constant 2 : i32
    %c8_i32_64 = arith.constant 8 : i32
    %116 = arith.muli %c2_i32, %c8_i32_64 : i32
    %117 = tpu.assume_multiple %116, 8 : i32
    %118 = arith.truncf %115 : vector<8x32xf32> to vector<8x32xbf16>
    %cst_65 = arith.constant dense<0.000000e+00> : vector<8x32xf32>
    %119 = tpu.matmul %118, %28, %cst_65 {dimension_numbers = #tpu.dot_dimension_numbers<[1], [0], [0], [1], [0, 0, 1, 1], [], []>} : vector<8x32xbf16>, vector<32x32xbf16>, vector<8x32xf32> -> vector<8x32xf32>
    %120 = vector.broadcast %34 : vector<1x32xf32> to vector<8x32xf32>
    %121 = arith.addf %119, %120 : vector<8x32xf32>
    %cst_66 = arith.constant dense<0.000000e+00> : vector<8x32xf32>
    %122 = tpu.matmul %118, %30, %cst_66 {dimension_numbers = #tpu.dot_dimension_numbers<[1], [0], [0], [1], [0, 0, 1, 1], [], []>} : vector<8x32xbf16>, vector<32x32xbf16>, vector<8x32xf32> -> vector<8x32xf32>
    %123 = vector.broadcast %36 : vector<1x32xf32> to vector<8x32xf32>
    %124 = arith.addf %122, %123 : vector<8x32xf32>
    %cst_67 = arith.constant dense<0.000000e+00> : vector<8x32xf32>
    %125 = tpu.matmul %118, %32, %cst_67 {dimension_numbers = #tpu.dot_dimension_numbers<[1], [0], [0], [1], [0, 0, 1, 1], [], []>} : vector<8x32xbf16>, vector<32x32xbf16>, vector<8x32xf32> -> vector<8x32xf32>
    %126 = vector.broadcast %38 : vector<1x32xf32> to vector<8x32xf32>
    %127 = arith.addf %125, %126 : vector<8x32xf32>
    %128 = arith.index_cast %117 : i32 to index
    %c0_68 = arith.constant 0 : index
    %129 = vector.load %arg8[%128, %c0_68] : memref<64x32xf32, #tpu.memory_space<vmem>>, vector<8x32xf32>
    %130 = arith.index_cast %117 : i32 to index
    %c0_69 = arith.constant 0 : index
    %131 = vector.load %arg9[%130, %c0_69] : memref<64x32xf32, #tpu.memory_space<vmem>>, vector<8x32xf32>
    %132 = arith.index_cast %117 : i32 to index
    %c0_70 = arith.constant 0 : index
    %133 = vector.load %arg10[%132, %c0_70] : memref<64x32xf32, #tpu.memory_space<vmem>>, vector<8x32xf32>
    %134 = arith.addf %129, %121 : vector<8x32xf32>
    %135 = arith.negf %134 : vector<8x32xf32>
    %136 = math.exp %135 : vector<8x32xf32>
    %cst_71 = arith.constant 1.000000e+00 : f32
    %137 = vector.broadcast %cst_71 : f32 to vector<8x32xf32>
    %138 = arith.addf %137, %136 : vector<8x32xf32>
    %139 = arith.divf %137, %138 : vector<8x32xf32>
    %140 = arith.addf %131, %124 : vector<8x32xf32>
    %141 = arith.negf %140 : vector<8x32xf32>
    %142 = math.exp %141 : vector<8x32xf32>
    %cst_72 = arith.constant 1.000000e+00 : f32
    %143 = vector.broadcast %cst_72 : f32 to vector<8x32xf32>
    %144 = arith.addf %143, %142 : vector<8x32xf32>
    %145 = arith.divf %143, %144 : vector<8x32xf32>
    %146 = arith.mulf %139, %127 : vector<8x32xf32>
    %147 = arith.addf %133, %146 : vector<8x32xf32>
    %148 = math.tanh %147 : vector<8x32xf32>
    %cst_73 = arith.constant 1.000000e+00 : f32
    %149 = vector.broadcast %cst_73 : f32 to vector<8x32xf32>
    %150 = arith.subf %149, %145 : vector<8x32xf32>
    %151 = arith.mulf %150, %148 : vector<8x32xf32>
    %152 = arith.mulf %145, %115 : vector<8x32xf32>
    %153 = arith.addf %151, %152 : vector<8x32xf32>
    %c3_i32 = arith.constant 3 : i32
    %c8_i32_74 = arith.constant 8 : i32
    %154 = arith.muli %c3_i32, %c8_i32_74 : i32
    %155 = tpu.assume_multiple %154, 8 : i32
    %156 = arith.truncf %153 : vector<8x32xf32> to vector<8x32xbf16>
    %cst_75 = arith.constant dense<0.000000e+00> : vector<8x32xf32>
    %157 = tpu.matmul %156, %28, %cst_75 {dimension_numbers = #tpu.dot_dimension_numbers<[1], [0], [0], [1], [0, 0, 1, 1], [], []>} : vector<8x32xbf16>, vector<32x32xbf16>, vector<8x32xf32> -> vector<8x32xf32>
    %158 = vector.broadcast %34 : vector<1x32xf32> to vector<8x32xf32>
    %159 = arith.addf %157, %158 : vector<8x32xf32>
    %cst_76 = arith.constant dense<0.000000e+00> : vector<8x32xf32>
    %160 = tpu.matmul %156, %30, %cst_76 {dimension_numbers = #tpu.dot_dimension_numbers<[1], [0], [0], [1], [0, 0, 1, 1], [], []>} : vector<8x32xbf16>, vector<32x32xbf16>, vector<8x32xf32> -> vector<8x32xf32>
    %161 = vector.broadcast %36 : vector<1x32xf32> to vector<8x32xf32>
    %162 = arith.addf %160, %161 : vector<8x32xf32>
    %cst_77 = arith.constant dense<0.000000e+00> : vector<8x32xf32>
    %163 = tpu.matmul %156, %32, %cst_77 {dimension_numbers = #tpu.dot_dimension_numbers<[1], [0], [0], [1], [0, 0, 1, 1], [], []>} : vector<8x32xbf16>, vector<32x32xbf16>, vector<8x32xf32> -> vector<8x32xf32>
    %164 = vector.broadcast %38 : vector<1x32xf32> to vector<8x32xf32>
    %165 = arith.addf %163, %164 : vector<8x32xf32>
    %166 = arith.index_cast %155 : i32 to index
    %c0_78 = arith.constant 0 : index
    %167 = vector.load %arg8[%166, %c0_78] : memref<64x32xf32, #tpu.memory_space<vmem>>, vector<8x32xf32>
    %168 = arith.index_cast %155 : i32 to index
    %c0_79 = arith.constant 0 : index
    %169 = vector.load %arg9[%168, %c0_79] : memref<64x32xf32, #tpu.memory_space<vmem>>, vector<8x32xf32>
    %170 = arith.index_cast %155 : i32 to index
    %c0_80 = arith.constant 0 : index
    %171 = vector.load %arg10[%170, %c0_80] : memref<64x32xf32, #tpu.memory_space<vmem>>, vector<8x32xf32>
    %172 = arith.addf %167, %159 : vector<8x32xf32>
    %173 = arith.negf %172 : vector<8x32xf32>
    %174 = math.exp %173 : vector<8x32xf32>
    %cst_81 = arith.constant 1.000000e+00 : f32
    %175 = vector.broadcast %cst_81 : f32 to vector<8x32xf32>
    %176 = arith.addf %175, %174 : vector<8x32xf32>
    %177 = arith.divf %175, %176 : vector<8x32xf32>
    %178 = arith.addf %169, %162 : vector<8x32xf32>
    %179 = arith.negf %178 : vector<8x32xf32>
    %180 = math.exp %179 : vector<8x32xf32>
    %cst_82 = arith.constant 1.000000e+00 : f32
    %181 = vector.broadcast %cst_82 : f32 to vector<8x32xf32>
    %182 = arith.addf %181, %180 : vector<8x32xf32>
    %183 = arith.divf %181, %182 : vector<8x32xf32>
    %184 = arith.mulf %177, %165 : vector<8x32xf32>
    %185 = arith.addf %171, %184 : vector<8x32xf32>
    %186 = math.tanh %185 : vector<8x32xf32>
    %cst_83 = arith.constant 1.000000e+00 : f32
    %187 = vector.broadcast %cst_83 : f32 to vector<8x32xf32>
    %188 = arith.subf %187, %183 : vector<8x32xf32>
    %189 = arith.mulf %188, %186 : vector<8x32xf32>
    %190 = arith.mulf %183, %153 : vector<8x32xf32>
    %191 = arith.addf %189, %190 : vector<8x32xf32>
    %c4_i32 = arith.constant 4 : i32
    %c8_i32_84 = arith.constant 8 : i32
    %192 = arith.muli %c4_i32, %c8_i32_84 : i32
    %193 = tpu.assume_multiple %192, 8 : i32
    %194 = arith.truncf %191 : vector<8x32xf32> to vector<8x32xbf16>
    %cst_85 = arith.constant dense<0.000000e+00> : vector<8x32xf32>
    %195 = tpu.matmul %194, %28, %cst_85 {dimension_numbers = #tpu.dot_dimension_numbers<[1], [0], [0], [1], [0, 0, 1, 1], [], []>} : vector<8x32xbf16>, vector<32x32xbf16>, vector<8x32xf32> -> vector<8x32xf32>
    %196 = vector.broadcast %34 : vector<1x32xf32> to vector<8x32xf32>
    %197 = arith.addf %195, %196 : vector<8x32xf32>
    %cst_86 = arith.constant dense<0.000000e+00> : vector<8x32xf32>
    %198 = tpu.matmul %194, %30, %cst_86 {dimension_numbers = #tpu.dot_dimension_numbers<[1], [0], [0], [1], [0, 0, 1, 1], [], []>} : vector<8x32xbf16>, vector<32x32xbf16>, vector<8x32xf32> -> vector<8x32xf32>
    %199 = vector.broadcast %36 : vector<1x32xf32> to vector<8x32xf32>
    %200 = arith.addf %198, %199 : vector<8x32xf32>
    %cst_87 = arith.constant dense<0.000000e+00> : vector<8x32xf32>
    %201 = tpu.matmul %194, %32, %cst_87 {dimension_numbers = #tpu.dot_dimension_numbers<[1], [0], [0], [1], [0, 0, 1, 1], [], []>} : vector<8x32xbf16>, vector<32x32xbf16>, vector<8x32xf32> -> vector<8x32xf32>
    %202 = vector.broadcast %38 : vector<1x32xf32> to vector<8x32xf32>
    %203 = arith.addf %201, %202 : vector<8x32xf32>
    %204 = arith.index_cast %193 : i32 to index
    %c0_88 = arith.constant 0 : index
    %205 = vector.load %arg8[%204, %c0_88] : memref<64x32xf32, #tpu.memory_space<vmem>>, vector<8x32xf32>
    %206 = arith.index_cast %193 : i32 to index
    %c0_89 = arith.constant 0 : index
    %207 = vector.load %arg9[%206, %c0_89] : memref<64x32xf32, #tpu.memory_space<vmem>>, vector<8x32xf32>
    %208 = arith.index_cast %193 : i32 to index
    %c0_90 = arith.constant 0 : index
    %209 = vector.load %arg10[%208, %c0_90] : memref<64x32xf32, #tpu.memory_space<vmem>>, vector<8x32xf32>
    %210 = arith.addf %205, %197 : vector<8x32xf32>
    %211 = arith.negf %210 : vector<8x32xf32>
    %212 = math.exp %211 : vector<8x32xf32>
    %cst_91 = arith.constant 1.000000e+00 : f32
    %213 = vector.broadcast %cst_91 : f32 to vector<8x32xf32>
    %214 = arith.addf %213, %212 : vector<8x32xf32>
    %215 = arith.divf %213, %214 : vector<8x32xf32>
    %216 = arith.addf %207, %200 : vector<8x32xf32>
    %217 = arith.negf %216 : vector<8x32xf32>
    %218 = math.exp %217 : vector<8x32xf32>
    %cst_92 = arith.constant 1.000000e+00 : f32
    %219 = vector.broadcast %cst_92 : f32 to vector<8x32xf32>
    %220 = arith.addf %219, %218 : vector<8x32xf32>
    %221 = arith.divf %219, %220 : vector<8x32xf32>
    %222 = arith.mulf %215, %203 : vector<8x32xf32>
    %223 = arith.addf %209, %222 : vector<8x32xf32>
    %224 = math.tanh %223 : vector<8x32xf32>
    %cst_93 = arith.constant 1.000000e+00 : f32
    %225 = vector.broadcast %cst_93 : f32 to vector<8x32xf32>
    %226 = arith.subf %225, %221 : vector<8x32xf32>
    %227 = arith.mulf %226, %224 : vector<8x32xf32>
    %228 = arith.mulf %221, %191 : vector<8x32xf32>
    %229 = arith.addf %227, %228 : vector<8x32xf32>
    %c5_i32 = arith.constant 5 : i32
    %c8_i32_94 = arith.constant 8 : i32
    %230 = arith.muli %c5_i32, %c8_i32_94 : i32
    %231 = tpu.assume_multiple %230, 8 : i32
    %232 = arith.truncf %229 : vector<8x32xf32> to vector<8x32xbf16>
    %cst_95 = arith.constant dense<0.000000e+00> : vector<8x32xf32>
    %233 = tpu.matmul %232, %28, %cst_95 {dimension_numbers = #tpu.dot_dimension_numbers<[1], [0], [0], [1], [0, 0, 1, 1], [], []>} : vector<8x32xbf16>, vector<32x32xbf16>, vector<8x32xf32> -> vector<8x32xf32>
    %234 = vector.broadcast %34 : vector<1x32xf32> to vector<8x32xf32>
    %235 = arith.addf %233, %234 : vector<8x32xf32>
    %cst_96 = arith.constant dense<0.000000e+00> : vector<8x32xf32>
    %236 = tpu.matmul %232, %30, %cst_96 {dimension_numbers = #tpu.dot_dimension_numbers<[1], [0], [0], [1], [0, 0, 1, 1], [], []>} : vector<8x32xbf16>, vector<32x32xbf16>, vector<8x32xf32> -> vector<8x32xf32>
    %237 = vector.broadcast %36 : vector<1x32xf32> to vector<8x32xf32>
    %238 = arith.addf %236, %237 : vector<8x32xf32>
    %cst_97 = arith.constant dense<0.000000e+00> : vector<8x32xf32>
    %239 = tpu.matmul %232, %32, %cst_97 {dimension_numbers = #tpu.dot_dimension_numbers<[1], [0], [0], [1], [0, 0, 1, 1], [], []>} : vector<8x32xbf16>, vector<32x32xbf16>, vector<8x32xf32> -> vector<8x32xf32>
    %240 = vector.broadcast %38 : vector<1x32xf32> to vector<8x32xf32>
    %241 = arith.addf %239, %240 : vector<8x32xf32>
    %242 = arith.index_cast %231 : i32 to index
    %c0_98 = arith.constant 0 : index
    %243 = vector.load %arg8[%242, %c0_98] : memref<64x32xf32, #tpu.memory_space<vmem>>, vector<8x32xf32>
    %244 = arith.index_cast %231 : i32 to index
    %c0_99 = arith.constant 0 : index
    %245 = vector.load %arg9[%244, %c0_99] : memref<64x32xf32, #tpu.memory_space<vmem>>, vector<8x32xf32>
    %246 = arith.index_cast %231 : i32 to index
    %c0_100 = arith.constant 0 : index
    %247 = vector.load %arg10[%246, %c0_100] : memref<64x32xf32, #tpu.memory_space<vmem>>, vector<8x32xf32>
    %248 = arith.addf %243, %235 : vector<8x32xf32>
    %249 = arith.negf %248 : vector<8x32xf32>
    %250 = math.exp %249 : vector<8x32xf32>
    %cst_101 = arith.constant 1.000000e+00 : f32
    %251 = vector.broadcast %cst_101 : f32 to vector<8x32xf32>
    %252 = arith.addf %251, %250 : vector<8x32xf32>
    %253 = arith.divf %251, %252 : vector<8x32xf32>
    %254 = arith.addf %245, %238 : vector<8x32xf32>
    %255 = arith.negf %254 : vector<8x32xf32>
    %256 = math.exp %255 : vector<8x32xf32>
    %cst_102 = arith.constant 1.000000e+00 : f32
    %257 = vector.broadcast %cst_102 : f32 to vector<8x32xf32>
    %258 = arith.addf %257, %256 : vector<8x32xf32>
    %259 = arith.divf %257, %258 : vector<8x32xf32>
    %260 = arith.mulf %253, %241 : vector<8x32xf32>
    %261 = arith.addf %247, %260 : vector<8x32xf32>
    %262 = math.tanh %261 : vector<8x32xf32>
    %cst_103 = arith.constant 1.000000e+00 : f32
    %263 = vector.broadcast %cst_103 : f32 to vector<8x32xf32>
    %264 = arith.subf %263, %259 : vector<8x32xf32>
    %265 = arith.mulf %264, %262 : vector<8x32xf32>
    %266 = arith.mulf %259, %229 : vector<8x32xf32>
    %267 = arith.addf %265, %266 : vector<8x32xf32>
    %c6_i32 = arith.constant 6 : i32
    %c8_i32_104 = arith.constant 8 : i32
    %268 = arith.muli %c6_i32, %c8_i32_104 : i32
    %269 = tpu.assume_multiple %268, 8 : i32
    %270 = arith.truncf %267 : vector<8x32xf32> to vector<8x32xbf16>
    %cst_105 = arith.constant dense<0.000000e+00> : vector<8x32xf32>
    %271 = tpu.matmul %270, %28, %cst_105 {dimension_numbers = #tpu.dot_dimension_numbers<[1], [0], [0], [1], [0, 0, 1, 1], [], []>} : vector<8x32xbf16>, vector<32x32xbf16>, vector<8x32xf32> -> vector<8x32xf32>
    %272 = vector.broadcast %34 : vector<1x32xf32> to vector<8x32xf32>
    %273 = arith.addf %271, %272 : vector<8x32xf32>
    %cst_106 = arith.constant dense<0.000000e+00> : vector<8x32xf32>
    %274 = tpu.matmul %270, %30, %cst_106 {dimension_numbers = #tpu.dot_dimension_numbers<[1], [0], [0], [1], [0, 0, 1, 1], [], []>} : vector<8x32xbf16>, vector<32x32xbf16>, vector<8x32xf32> -> vector<8x32xf32>
    %275 = vector.broadcast %36 : vector<1x32xf32> to vector<8x32xf32>
    %276 = arith.addf %274, %275 : vector<8x32xf32>
    %cst_107 = arith.constant dense<0.000000e+00> : vector<8x32xf32>
    %277 = tpu.matmul %270, %32, %cst_107 {dimension_numbers = #tpu.dot_dimension_numbers<[1], [0], [0], [1], [0, 0, 1, 1], [], []>} : vector<8x32xbf16>, vector<32x32xbf16>, vector<8x32xf32> -> vector<8x32xf32>
    %278 = vector.broadcast %38 : vector<1x32xf32> to vector<8x32xf32>
    %279 = arith.addf %277, %278 : vector<8x32xf32>
    %280 = arith.index_cast %269 : i32 to index
    %c0_108 = arith.constant 0 : index
    %281 = vector.load %arg8[%280, %c0_108] : memref<64x32xf32, #tpu.memory_space<vmem>>, vector<8x32xf32>
    %282 = arith.index_cast %269 : i32 to index
    %c0_109 = arith.constant 0 : index
    %283 = vector.load %arg9[%282, %c0_109] : memref<64x32xf32, #tpu.memory_space<vmem>>, vector<8x32xf32>
    %284 = arith.index_cast %269 : i32 to index
    %c0_110 = arith.constant 0 : index
    %285 = vector.load %arg10[%284, %c0_110] : memref<64x32xf32, #tpu.memory_space<vmem>>, vector<8x32xf32>
    %286 = arith.addf %281, %273 : vector<8x32xf32>
    %287 = arith.negf %286 : vector<8x32xf32>
    %288 = math.exp %287 : vector<8x32xf32>
    %cst_111 = arith.constant 1.000000e+00 : f32
    %289 = vector.broadcast %cst_111 : f32 to vector<8x32xf32>
    %290 = arith.addf %289, %288 : vector<8x32xf32>
    %291 = arith.divf %289, %290 : vector<8x32xf32>
    %292 = arith.addf %283, %276 : vector<8x32xf32>
    %293 = arith.negf %292 : vector<8x32xf32>
    %294 = math.exp %293 : vector<8x32xf32>
    %cst_112 = arith.constant 1.000000e+00 : f32
    %295 = vector.broadcast %cst_112 : f32 to vector<8x32xf32>
    %296 = arith.addf %295, %294 : vector<8x32xf32>
    %297 = arith.divf %295, %296 : vector<8x32xf32>
    %298 = arith.mulf %291, %279 : vector<8x32xf32>
    %299 = arith.addf %285, %298 : vector<8x32xf32>
    %300 = math.tanh %299 : vector<8x32xf32>
    %cst_113 = arith.constant 1.000000e+00 : f32
    %301 = vector.broadcast %cst_113 : f32 to vector<8x32xf32>
    %302 = arith.subf %301, %297 : vector<8x32xf32>
    %303 = arith.mulf %302, %300 : vector<8x32xf32>
    %304 = arith.mulf %297, %267 : vector<8x32xf32>
    %305 = arith.addf %303, %304 : vector<8x32xf32>
    %c7_i32 = arith.constant 7 : i32
    %c8_i32_114 = arith.constant 8 : i32
    %306 = arith.muli %c7_i32, %c8_i32_114 : i32
    %307 = tpu.assume_multiple %306, 8 : i32
    %308 = arith.truncf %305 : vector<8x32xf32> to vector<8x32xbf16>
    %cst_115 = arith.constant dense<0.000000e+00> : vector<8x32xf32>
    %309 = tpu.matmul %308, %28, %cst_115 {dimension_numbers = #tpu.dot_dimension_numbers<[1], [0], [0], [1], [0, 0, 1, 1], [], []>} : vector<8x32xbf16>, vector<32x32xbf16>, vector<8x32xf32> -> vector<8x32xf32>
    %310 = vector.broadcast %34 : vector<1x32xf32> to vector<8x32xf32>
    %311 = arith.addf %309, %310 : vector<8x32xf32>
    %cst_116 = arith.constant dense<0.000000e+00> : vector<8x32xf32>
    %312 = tpu.matmul %308, %30, %cst_116 {dimension_numbers = #tpu.dot_dimension_numbers<[1], [0], [0], [1], [0, 0, 1, 1], [], []>} : vector<8x32xbf16>, vector<32x32xbf16>, vector<8x32xf32> -> vector<8x32xf32>
    %313 = vector.broadcast %36 : vector<1x32xf32> to vector<8x32xf32>
    %314 = arith.addf %312, %313 : vector<8x32xf32>
    %cst_117 = arith.constant dense<0.000000e+00> : vector<8x32xf32>
    %315 = tpu.matmul %308, %32, %cst_117 {dimension_numbers = #tpu.dot_dimension_numbers<[1], [0], [0], [1], [0, 0, 1, 1], [], []>} : vector<8x32xbf16>, vector<32x32xbf16>, vector<8x32xf32> -> vector<8x32xf32>
    %316 = vector.broadcast %38 : vector<1x32xf32> to vector<8x32xf32>
    %317 = arith.addf %315, %316 : vector<8x32xf32>
    %318 = arith.index_cast %307 : i32 to index
    %c0_118 = arith.constant 0 : index
    %319 = vector.load %arg8[%318, %c0_118] : memref<64x32xf32, #tpu.memory_space<vmem>>, vector<8x32xf32>
    %320 = arith.index_cast %307 : i32 to index
    %c0_119 = arith.constant 0 : index
    %321 = vector.load %arg9[%320, %c0_119] : memref<64x32xf32, #tpu.memory_space<vmem>>, vector<8x32xf32>
    %322 = arith.index_cast %307 : i32 to index
    %c0_120 = arith.constant 0 : index
    %323 = vector.load %arg10[%322, %c0_120] : memref<64x32xf32, #tpu.memory_space<vmem>>, vector<8x32xf32>
    %324 = arith.addf %319, %311 : vector<8x32xf32>
    %325 = arith.negf %324 : vector<8x32xf32>
    %326 = math.exp %325 : vector<8x32xf32>
    %cst_121 = arith.constant 1.000000e+00 : f32
    %327 = vector.broadcast %cst_121 : f32 to vector<8x32xf32>
    %328 = arith.addf %327, %326 : vector<8x32xf32>
    %329 = arith.divf %327, %328 : vector<8x32xf32>
    %330 = arith.addf %321, %314 : vector<8x32xf32>
    %331 = arith.negf %330 : vector<8x32xf32>
    %332 = math.exp %331 : vector<8x32xf32>
    %cst_122 = arith.constant 1.000000e+00 : f32
    %333 = vector.broadcast %cst_122 : f32 to vector<8x32xf32>
    %334 = arith.addf %333, %332 : vector<8x32xf32>
    %335 = arith.divf %333, %334 : vector<8x32xf32>
    %336 = arith.mulf %329, %317 : vector<8x32xf32>
    %337 = arith.addf %323, %336 : vector<8x32xf32>
    %338 = math.tanh %337 : vector<8x32xf32>
    %cst_123 = arith.constant 1.000000e+00 : f32
    %339 = vector.broadcast %cst_123 : f32 to vector<8x32xf32>
    %340 = arith.subf %339, %335 : vector<8x32xf32>
    %341 = arith.mulf %340, %338 : vector<8x32xf32>
    %342 = arith.mulf %335, %305 : vector<8x32xf32>
    %343 = arith.addf %341, %342 : vector<8x32xf32>
    %c8_i32_124 = arith.constant 8 : i32
    %344 = arith.mulf %343, %343 : vector<8x32xf32>
    %cst_125 = arith.constant dense<0.000000e+00> : vector<8xf32>
    %345 = vector.multi_reduction <add>, %344, %cst_125 [1] : vector<8x32xf32> to vector<8xf32>
    %346 = vector.shape_cast %345 : vector<8xf32> to vector<8x1xf32>
    %cst_126 = arith.constant 1.000000e-24 : f32
    %347 = vector.broadcast %cst_126 : f32 to vector<8x1xf32>
    %348 = arith.maximumf %346, %347 : vector<8x1xf32>
    %349 = math.rsqrt %348 : vector<8x1xf32>
    %350 = vector.broadcast %349 : vector<8x1xf32> to vector<8x32xf32>
    %351 = arith.mulf %343, %350 : vector<8x32xf32>
    %c0_127 = arith.constant 0 : index
    %c0_128 = arith.constant 0 : index
    %c0_129 = arith.constant 0 : index
    %352 = vector.load %arg2[%c0_127, %c0_128, %c0_129] : memref<8x8x32xf32, #tpu.memory_space<vmem>>, vector<8x8x32xf32>
    %353 = arith.mulf %352, %352 : vector<8x8x32xf32>
    %cst_130 = arith.constant dense<0.000000e+00> : vector<8x8xf32>
    %354 = vector.multi_reduction <add>, %353, %cst_130 [2] : vector<8x8x32xf32> to vector<8x8xf32>
    %355 = vector.shape_cast %354 : vector<8x8xf32> to vector<8x8x1xf32>
    %cst_131 = arith.constant 1.000000e-24 : f32
    %356 = vector.broadcast %cst_131 : f32 to vector<8x8x1xf32>
    %357 = arith.maximumf %355, %356 : vector<8x8x1xf32>
    %358 = math.rsqrt %357 : vector<8x8x1xf32>
    %359 = vector.broadcast %358 : vector<8x8x1xf32> to vector<8x8x32xf32>
    %360 = arith.mulf %352, %359 : vector<8x8x32xf32>
    %361 = vector.shape_cast %351 : vector<8x32xf32> to vector<8x1x32xf32>
    %362 = vector.broadcast %361 : vector<8x1x32xf32> to vector<8x8x32xf32>
    %363 = arith.mulf %360, %362 : vector<8x8x32xf32>
    %cst_132 = arith.constant dense<0.000000e+00> : vector<8x8xf32>
    %364 = vector.multi_reduction <add>, %363, %cst_132 [2] : vector<8x8x32xf32> to vector<8x8xf32>
    %c0_133 = arith.constant 0 : index
    %c0_134 = arith.constant 0 : index
    %365 = vector.load %arg7[%c0_133, %c0_134] : memref<8x8xf32, #tpu.memory_space<vmem>>, vector<8x8xf32>
    tpu.vector_store %arg7[%c0_133, %c0_134], %364 {strides = array<i32>} : memref<8x8xf32, #tpu.memory_space<vmem>>, vector<8x8xf32>,
    return
  }
  func.func @transform_0(%arg0: i32) -> (i32, i32, i32) {
    %c0_i32 = arith.constant 0 : i32
    %c0_i32_0 = arith.constant 0 : i32
    %c0_i32_1 = arith.constant 0 : i32
    return %c0_i32, %arg0, %c0_i32_0 : i32, i32, i32
  }
  func.func @transform_1(%arg0: i32) -> (i32, i32, i32) {
    %c0_i32 = arith.constant 0 : i32
    %c0_i32_0 = arith.constant 0 : i32
    %c0_i32_1 = arith.constant 0 : i32
    return %arg0, %c0_i32, %c0_i32_0 : i32, i32, i32
  }
  func.func @transform_2(%arg0: i32) -> (i32, i32, i32) {
    %c0_i32 = arith.constant 0 : i32
    %c0_i32_0 = arith.constant 0 : i32
    %c0_i32_1 = arith.constant 0 : i32
    %c0_i32_2 = arith.constant 0 : i32
    return %c0_i32, %c0_i32_0, %c0_i32_1 : i32, i32, i32
  }
  func.func @transform_3(%arg0: i32) -> (i32, i32, i32) {
    %c0_i32 = arith.constant 0 : i32
    %c0_i32_0 = arith.constant 0 : i32
    %c0_i32_1 = arith.constant 0 : i32
    %c0_i32_2 = arith.constant 0 : i32
    return %c0_i32, %c0_i32_0, %c0_i32_1 : i32, i32, i32
  }
  func.func @transform_4(%arg0: i32) -> (i32, i32, i32) {
    %c0_i32 = arith.constant 0 : i32
    %c0_i32_0 = arith.constant 0 : i32
    %c0_i32_1 = arith.constant 0 : i32
    %c0_i32_2 = arith.constant 0 : i32
    return %c0_i32, %c0_i32_0, %c0_i32_1 : i32, i32, i32
  }
  func.func @transform_5(%arg0: i32) -> (i32, i32, i32) {
    %c0_i32 = arith.constant 0 : i32
    %c0_i32_0 = arith.constant 0 : i32
    %c0_i32_1 = arith.constant 0 : i32
    %c0_i32_2 = arith.constant 0 : i32
    return %c0_i32, %c0_i32_0, %c0_i32_1 : i32, i32, i32
  }
  func.func @transform_6(%arg0: i32) -> (i32, i32) {
    %c0_i32 = arith.constant 0 : i32
    %c0_i32_0 = arith.constant 0 : i32
    return %arg0, %c0_i32 : i32, i32
  }
}

</mosaic_0001>

<bundles_post_ra>
// kernel: gru4recpp_forward.3
= control target key start
LH: loop header
LB: loop body
LE: loop exit
PB: predicated region body
PF: predicated region fallthrough
CT: control target
= control target key end

     0   :  { %vm25_vm0 = vcmask 1041408   ;;  %v90_v0 = vmov 0.0   ;;  %vm91_vm1 = vmmov 0   ;;  %vm21_vm2 = vcmask 31744   ;;  %s133_s2 = inlined_call_operand.vmem [shape: bf16[4,32], index: 2, kind: input, shape index: {}]   ;;  %s134_s1 = inlined_call_operand.vmem [shape: f32[16,4], index: 1, kind: input, shape index: {}]   ;;  %s135_s0 = inlined_call_operand.vmem [shape: f32[16,32], index: 0, kind: input, shape index: {}]   ;;  %s136_s3 = inlined_call_operand.vmem [shape: f32[16,32], index: 3, kind: output, shape index: {}]  }
   0x1   :  { %82 = vmatprep.subr.bf16.mxu0 %v90_v0  ;;  %v20_v1 = vld [vmem:[%s133_s2] sm:$0x3]  ;;  %84 = vmatprep.mubr.msk.bf16.mxu0 %vm91_vm1, %v90_v0  ;;  %v16_v3 = vld [vmem:[%s134_s1 + $0x8] sm:$0xff]  ;;  %vm72_vm3 = vcmask 261120  }
   0x2   :  { %v15_v2 = vld [vmem:[%s134_s1] sm:$0xff]  ;;  %v27_v4 = vsel %vm25_vm0, %v20_v1, 0  ;;  %v19_v10 = vld [vmem:[%s135_s0 + $0x8] sm:$0xff] }
   0x3   :  { %v17_v5 = vpack.c.bf16 %v16_v3, %v15_v2  ;;  %83 = vmatpush3.bf16.msra.mxu0 %v27_v4  ;;  %v18_v6 = vld [vmem:[%s135_s0] sm:$0xff] }
   0x6   :  { %85 = vmatmul.mubr.msk.bf16.vlgmr.msra.gmra.mxu0 %vm21_vm2, %v17_v5 }
  0xc6   :  { %v63_v7 = vpop.f32.mrf.mxu0 }
  0xc7   :  { %v70_v8 = vadd.f32 %v63_v7, %v18_v6 }
  0xc8   :  { %v86_v9 = vpop.f32.mrf.mxu0 }
  0xc9   :  { %73 = vst.msk [vmem:[%s136_s3] sm:$0xff] %vm72_vm3, %v70_v8 }
  0xca   :  { %v66_v11 = vpop.f32.mrf.mxu0 }
  0xcb   :  { %v71_v12 = vadd.f32 %v66_v11, %v19_v10 }
  0xcc   :  { %v87_v13 = vpop.f32.mrf.mxu0 }
  0xcd   :  { %74 = vst.msk [vmem:[%s136_s3 + $0x8] sm:$0xff] %vm72_vm3, %v71_v12 }

// kernel: gru4recpp_forward.5
= control target key start
LH: loop header
LB: loop body
LE: loop exit
PB: predicated region body
PF: predicated region fallthrough
CT: control target
= control target key end

     0   :  { %vm59_vm0 = vcmask 261120   ;;  %v2393_v14 = vmov 0.0   ;;  %vm2394_vm1 = vmmov 0   ;;  %v2395_v23 = vmov 0   ;;  %s2852_s2 = inlined_call_operand.vmem [shape: bf16[3,32,32], index: 2, kind: input, shape index: {}]   ;;  %s2853_s0 = inlined_call_operand.vmem [shape: f32[8,8,32], index: 0, kind: input, shape index: {}]   ;;  %s2854_s3 = inlined_call_operand.vmem [shape: bf16[3,32,32], index: 3, kind: input, shape index: {}]   ;;  %s2855_s4 = inlined_call_operand.vmem [shape: f32[3,1,32], index: 4, kind: input, shape index: {}]   ;;  %s2856_s5 = inlined_call_operand.vmem [shape: f32[3,1,32], index: 5, kind: input, shape index: {}]   ;;  %s2857_s1 = inlined_call_operand.vmem [shape: f32[8,8,32], index: 1, kind: input, shape index: {}]   ;;  %s2858_s6 = inlined_call_operand.vmem [shape: f32[8,8], index: 6, kind: output, shape index: {}]  }
   0x1   :  { %v2283_v0 = vld [vmem:[%s2852_s2 + $0x18] sm:$0xff]   ;;  %v2284_v1 = vld [vmem:[%s2852_s2 + $0x8] sm:$0xff]   ;;  %v2285_v2 = vld [vmem:[%s2852_s2 + $0x10] sm:$0xff]   ;;  %vm1853_vm2 = vcmask 1041409   ;;  %vm1855_vm3 = vcmask 1042434   ;;  %vm1857_vm4 = vcmask 1043459  }
   0x2   :  { %2063 = vmatprep.subr.bf16.mxu1 %v2283_v0  ;;  %2051 = vmatprep.subr.bf16.mxu0 %v2284_v1  ;;  %v2286_v3 = vld [vmem:[%s2852_s2] sm:$0xff]   ;;  %v25_v5 = vld [vmem:[%s2853_s0 + $0x8] sm:$0xff]  ;;  %v26_v6 = vld [vmem:[%s2853_s0 + $0x10] sm:$0xff]  ;;  %vm1859_vm5 = vcmask 1044484   ;;  %vm1861_vm6 = vcmask 1045509   ;;  %vm1863_vm7 = vcmask 1046534  }
   0x3   :  { %2064 = vmatpush3.bf16.msra.mxu1 %v2283_v0  ;;  %2052 = vmatpush3.bf16.msra.mxu0 %v2284_v1  ;;  %v24_v4 = vld [vmem:[%s2853_s0] sm:$0xff]  ;;  %v27_v8 = vld [vmem:[%s2853_s0 + $0x18] sm:$0xff]  ;;  %v29_v11 = vld [vmem:[%s2853_s0 + $0x28] sm:$0xff]  ;;  %vm1865_vm8 = vcmask 1047559   ;;  %vm1868_vm9 = vcmask 64512  }
   0x4   :  { %2065 = vmatprep.subr.bf16.mxu1 %v2285_v2  ;;  %2053 = vmatprep.subr.bf16.mxu0 %v2286_v3  ;;  %v32_v7 = vpack.c.bf16 %v25_v5, %v24_v4  ;;  %v33_v9 = vpack.c.bf16 %v27_v8, %v26_v6  ;;  %v28_v10 = vld [vmem:[%s2853_s0 + $0x20] sm:$0xff]  ;;  %v2466_v12 = vld [vmem:[%s2854_s3 + $0x8] sm:$0xff]   ;;  %v30_v15 = vld [vmem:[%s2853_s0 + $0x30] sm:$0xff] }
   0x5   :  { %v34_v13 = vpack.c.bf16 %v29_v11, %v28_v10  ;;  %v31_v16 = vld [vmem:[%s2853_s0 + $0x38] sm:$0xff]  ;;  %v2290_v17 = vld [vmem:[%s2852_s2 + $0x28] sm:$0xff]   ;;  %v2485_v18 = vld [vmem:[%s2854_s3] sm:$0xff]  }
   0x6   :  { %2067 = vmatprep.mubr.msk.bf16.mxu1 %vm59_vm0, %v32_v7  ;;  %2055 = vmatprep.mubr.msk.bf16.mxu0 %vm59_vm0, %v32_v7  ;;  %v2292_v19 = vld [vmem:[%s2852_s2 + $0x20] sm:$0xff]   ;;  %v35_v20 = vpack.c.bf16 %v31_v16, %v30_v15  ;;  %v2504_v21 = vld [vmem:[%s2854_s3 + $0x18] sm:$0xff]   ;;  %v2509_v22 = vld [vmem:[%s2854_s3 + $0x28] sm:$0xff]  }
   0x7   :  { %2066 = vmatpush3.bf16.msra.mxu1 %v2285_v2  ;;  %2054 = vmatpush3.bf16.msra.mxu0 %v2286_v3  ;;  %v2515_v24 = vld [vmem:[%s2854_s3 + $0x10] sm:$0xff]   ;;  %v2526_v25 = vld [vmem:[%s2854_s3 + $0x20] sm:$0xff]  }
   0x8   :  { %2087 = vmatprep.subr.bf16.mxu1 %v2393_v14  ;;  %2075 = vmatprep.subr.bf16.mxu0 %v2290_v17  ;;  %v1886_v26 = vld [vmem:[%s2855_s4 + $0x1] ss:$0 sm:$0xff]  ;;  %v1874_v27 = vld [vmem:[%s2855_s4] ss:$0 sm:$0xff]  ;;  %v1898_v62 = vld [vmem:[%s2855_s4 + $0x2] ss:$0 sm:$0xff] }
   0x9   :  { %v2568_v56 = vld [vmem:[%s2856_s5] ss:$0 sm:$0xff]  ;;  %v2583_v10 = vld [vmem:[%s2856_s5 + $0x1] ss:$0 sm:$0xff] }
   0xa   :  { %2068 = vmatmul.mubr.msk.bf16.vlgmr.msra.gmra.mxu1 %vm59_vm0, %v33_v9  ;;  %2056 = vmatmul.mubr.msk.bf16.vlgmr.msra.gmra.mxu0 %vm59_vm0, %v33_v9 }
   0xb   :  { %2088 = vmatpush3.bf16.msra.mxu1 %v2466_v12  ;;  %2071 = vmatprep.mubr.msk.bf16.mxu1 %vm59_vm0, %v34_v13 }
   0xc   :  { %2089 = vmatprep.subr.bf16.mxu1 %v2393_v14  ;;  %2059 = vmatprep.mubr.msk.bf16.mxu0 %vm59_vm0, %v34_v13 }
   0xd   :  { %2076 = vmatpush3.bf16.msra.mxu0 %v2290_v17 }
   0xe   :  { %2077 = vmatprep.subr.bf16.mxu0 %v2292_v19 }
   0xf   :  { %2090 = vmatpush3.bf16.msra.mxu1 %v2485_v18 }
  0x10   :  { %2095 = vmatprep.subr.bf16.mxu1 %v2393_v14 }
  0x11   :  { %2078 = vmatpush3.bf16.msra.mxu0 %v2292_v19 }
  0x12   :  { %2072 = vmatmul.mubr.msk.bf16.gmra.mxu1 %vm59_vm0, %v35_v20  ;;  %2060 = vmatmul.mubr.msk.bf16.gmra.mxu0 %vm59_vm0, %v35_v20 }
  0x13   :  { %2091 = vmatprep.mubr.msk.bf16.mxu1 %vm2394_vm1, %v2393_v14  ;;  %2079 = vmatprep.mubr.msk.bf16.mxu0 %vm59_vm0, %v32_v7 }
  0x14   :  { %2103 = vmatprep.subr.bf16.mxu0 %v2393_v14 }
  0x1a   :  { %2092 = vmatmul.mubr.bf16.vlgmr.msra.gmra.mxu1 %v2395_v23  ;;  %2080 = vmatmul.mubr.msk.bf16.vlgmr.msra.gmra.mxu0 %vm59_vm0, %v33_v9 }
  0x1b   :  { %2096 = vmatpush3.bf16.msra.mxu1 %v2504_v21  ;;  %2099 = vmatprep.mubr.msk.bf16.mxu1 %vm2394_vm1, %v2393_v14 }
  0x1c   :  { %2097 = vmatprep.subr.bf16.mxu1 %v2393_v14  ;;  %2104 = vmatpush3.bf16.msra.mxu0 %v2509_v22 }
  0x1d   :  { %2083 = vmatprep.mubr.msk.bf16.mxu0 %vm59_vm0, %v34_v13  ;;  %2105 = vmatprep.subr.bf16.mxu0 %v2393_v14 }
  0x1f   :  { %2098 = vmatpush3.bf16.msra.mxu1 %v2515_v24 }
  0x20   :  { %2111 = vmatprep.subr.bf16.mxu1 %v2393_v14  ;;  %2106 = vmatpush3.bf16.msra.mxu0 %v2526_v25 }
  0x21   :  { %2119 = vmatprep.subr.bf16.mxu0 %v2393_v14 }
  0x22   :  { %2100 = vmatmul.mubr.bf16.vlgmr.msra.gmra.mxu1 %v2395_v23  ;;  %2084 = vmatmul.mubr.msk.bf16.gmra.mxu0 %vm59_vm0, %v35_v20 }
  0x23   :  { %2112 = vmatpush3.bf16.msra.mxu1 %v2466_v12  ;;  %2115 = vmatprep.mubr.msk.bf16.mxu1 %vm2394_vm1, %v2393_v14 }
  0x24   :  { %2113 = vmatprep.subr.bf16.mxu1 %v2393_v14  ;;  %2107 = vmatprep.mubr.msk.bf16.mxu0 %vm2394_vm1, %v2393_v14 }
  0x27   :  { %2114 = vmatpush3.bf16.msra.mxu1 %v2485_v18 }
  0x28   :  { %2127 = vmatprep.subr.bf16.mxu1 %v2393_v14 }
  0x2a   :  { %2108 = vmatmul.mubr.bf16.vlgmr.msra.gmra.mxu0 %v2395_v23 }
  0x2b   :  { %2120 = vmatpush3.bf16.msra.mxu0 %v2504_v21  ;;  %2123 = vmatprep.mubr.msk.bf16.mxu0 %vm2394_vm1, %v2393_v14 }
  0x2c   :  { %2121 = vmatprep.subr.bf16.mxu0 %v2393_v14 }
  0x2f   :  { %2122 = vmatpush3.bf16.msra.mxu0 %v2515_v24 }
  0x30   :  { %2135 = vmatprep.subr.bf16.mxu0 %v2393_v14 }
  0xca   :  { %v2069_v28 = vpop.f32.mrf.mxu1  ;;  %v2057_v30 = vpop.f32.mrf.mxu0 }
  0xcb   :  { %v213_v29 = vadd.f32 %v2069_v28, %v1886_v26  ;;  %v115_v31 = vadd.f32 %v2057_v30, %v1874_v27 }
  0xcc   :  { %v204_v32 = vpop.f32.mrf.mxu1  ;;  %v106_v34 = vpop.f32.mrf.mxu0 }
  0xcd   :  { %237 = vst.msk [vmem:[#allocation3 + $0x10] sm:$0xff] %vm59_vm0, %v213_v29  ;;  %v205_v33 = vadd.f32 %v1886_v26, %v204_v32  ;;  %139 = vst.msk [vmem:[#allocation2 + $0x10] sm:$0xff] %vm59_vm0, %v115_v31  ;;  %v107_v35 = vadd.f32 %v1874_v27, %v106_v34 }
  0xce   :  { %v2070_v36 = vpop.f32.mrf.mxu1  ;;  %v2058_v38 = vpop.f32.mrf.mxu0 }
  0xcf   :  { %235 = vst.msk [vmem:[#allocation3] sm:$0xff] %vm59_vm0, %v205_v33  ;;  %v216_v37 = vadd.f32 %v2070_v36, %v1886_v26  ;;  %137 = vst.msk [vmem:[#allocation2] sm:$0xff] %vm59_vm0, %v107_v35  ;;  %v118_v39 = vadd.f32 %v2058_v38, %v1874_v27 }
  0xd0   :  { %v207_v40 = vpop.f32.mrf.mxu1  ;;  %v109_v42 = vpop.f32.mrf.mxu0 }
  0xd1   :  { %238 = vst.msk [vmem:[#allocation3 + $0x18] sm:$0xff] %vm59_vm0, %v216_v37  ;;  %v208_v41 = vadd.f32 %v1886_v26, %v207_v40  ;;  %140 = vst.msk [vmem:[#allocation2 + $0x18] sm:$0xff] %vm59_vm0, %v118_v39  ;;  %v110_v43 = vadd.f32 %v1874_v27, %v109_v42 }
  0xd2   :  { %v2073_v44 = vpop.f32.mrf.mxu1  ;;  %v2061_v46 = vpop.f32.mrf.mxu0 }
  0xd3   :  { %236 = vst.msk [vmem:[#allocation3 + $0x8] sm:$0xff] %vm59_vm0, %v208_v41  ;;  %v229_v45 = vadd.f32 %v2073_v44, %v1886_v26  ;;  %138 = vst.msk [vmem:[#allocation2 + $0x8] sm:$0xff] %vm59_vm0, %v110_v43  ;;  %v131_v48 = vadd.f32 %v2061_v46, %v1874_v27 }
  0xd4   :  { %v220_v47 = vpop.f32.mrf.mxu1  ;;  %v122_v50 = vpop.f32.mrf.mxu0 }
  0xd5   :  { %241 = vst.msk [vmem:[#allocation3 + $0x30] sm:$0xff] %vm59_vm0, %v229_v45  ;;  %v221_v49 = vadd.f32 %v1886_v26, %v220_v47  ;;  %143 = vst.msk [vmem:[#allocation2 + $0x30] sm:$0xff] %vm59_vm0, %v131_v48  ;;  %v123_v52 = vadd.f32 %v1874_v27, %v122_v50  ;;  %v2596_v45 = vld [vmem:[%s2856_s5 + $0x2] ss:$0 sm:$0xff] }
  0xd6   :  { %v2074_v51 = vpop.f32.mrf.mxu1  ;;  %v2062_v54 = vpop.f32.mrf.mxu0  ;;  %v537_v0 = vld [vmem:[#allocation2] sm:$0xff] }
  0xd7   :  { %239 = vst.msk [vmem:[#allocation3 + $0x20] sm:$0xff] %vm59_vm0, %v221_v49  ;;  %v232_v53 = vadd.f32 %v2074_v51, %v1886_v26  ;;  %141 = vst.msk [vmem:[#allocation2 + $0x20] sm:$0xff] %vm59_vm0, %v123_v52  ;;  %v134_v57 = vadd.f32 %v2062_v54, %v1874_v27  ;;  %v538_v20 = vld [vmem:[#allocation3] sm:$0xff] }
  0xd8   :  { %v223_v55 = vpop.f32.mrf.mxu1  ;;  %v125_v59 = vpop.f32.mrf.mxu0 }
  0xd9   :  { %242 = vst.msk [vmem:[#allocation3 + $0x38] sm:$0xff] %vm59_vm0, %v232_v53  ;;  %v224_v58 = vadd.f32 %v1886_v26, %v223_v55  ;;  %144 = vst.msk [vmem:[#allocation2 + $0x38] sm:$0xff] %vm59_vm0, %v134_v57  ;;  %v126_v61 = vadd.f32 %v1874_v27, %v125_v59 }
  0xda   :  { %v415_v60 = vpop.f32.mrf.mxu1  ;;  %v2081_v2 = vpop.f32.mrf.mxu0 }
  0xdb   :  { %240 = vst.msk [vmem:[#allocation3 + $0x28] sm:$0xff] %vm59_vm0, %v224_v58  ;;  %v416_v63 = vadd.f32 %v2568_v56, %v415_v60  ;;  %142 = vst.msk [vmem:[#allocation2 + $0x28] sm:$0xff] %vm59_vm0, %v126_v61  ;;  %v311_v4 = vadd.f32 %v2081_v2, %v1898_v62 }
  0xdc   :  { %v2093_v1 = vpop.f32.mrf.mxu1  ;;  %v302_v6 = vpop.f32.mrf.mxu0 }
  0xdd   :  { %v540_v3 = vadd.f32 %v537_v0, %v416_v63  ;;  %335 = vst.msk [vmem:[#allocation4 + $0x10] sm:$0xff] %vm59_vm0, %v311_v4  ;;  %v303_v8 = vadd.f32 %v1898_v62, %v302_v6  ;;  %v686_v63 = vld [vmem:[#allocation2 + $0x8] sm:$0xff] }
  0xde   :  { %v418_v5 = vpop.f32.mrf.mxu1  ;;  %v2082_v11 = vpop.f32.mrf.mxu0 }
  0xdf   :  { %v1924_v7 = vmul.f32 -1.442695, %v540_v3  ;;  %333 = vst.msk [vmem:[#allocation4] sm:$0xff] %vm59_vm0, %v303_v8  ;;  %v314_v13 = vadd.f32 %v2082_v11, %v1898_v62 }
  0xe0   :  { %v2094_v9 = vpop.f32.mrf.mxu1  ;;  %v305_v16 = vpop.f32.mrf.mxu0 }
  0xe1   :  { %2295 = vpow2.f32 %v1924_v7  ;;  %336 = vst.msk [vmem:[#allocation4 + $0x18] sm:$0xff] %vm59_vm0, %v314_v13  ;;  %v306_v19 = vadd.f32 %v1898_v62, %v305_v16  ;;  %v688_v9 = vld [vmem:[#allocation3 + $0x8] sm:$0xff] }
  0xe2   :  { %v473_v15 = vpop.f32.mrf.mxu1  ;;  %v2085_v26 = vpop.f32.mrf.mxu0 }
  0xe3   :  { %v474_v17 = vadd.f32 %v2583_v10, %v473_v15  ;;  %334 = vst.msk [vmem:[#allocation4 + $0x8] sm:$0xff] %vm59_vm0, %v306_v19  ;;  %v327_v28 = vadd.f32 %v2085_v26, %v1898_v62 }
  0xe4   :  { %v2101_v23 = vpop.f32.mrf.mxu1  ;;  %v318_v30 = vpop.f32.mrf.mxu0 }
  0xe5   :  { %v547_v27 = vadd.f32 %v538_v20, %v474_v17  ;;  %339 = vst.msk [vmem:[#allocation4 + $0x30] sm:$0xff] %vm59_vm0, %v327_v28  ;;  %v319_v32 = vadd.f32 %v1898_v62, %v318_v30 }
  0xe6   :  { %v476_v29 = vpop.f32.mrf.mxu1  ;;  %v2086_v34 = vpop.f32.mrf.mxu0  ;;  %v539_v50 = vld [vmem:[#allocation4] sm:$0xff] }
  0xe7   :  { %v1925_v31 = vmul.f32 -1.442695, %v547_v27  ;;  %337 = vst.msk [vmem:[#allocation4 + $0x20] sm:$0xff] %vm59_vm0, %v319_v32  ;;  %v330_v35 = vadd.f32 %v2086_v34, %v1898_v62 }
  0xe8   :  { %v2102_v33 = vpop.f32.mrf.mxu1  ;;  %v321_v36 = vpop.f32.mrf.mxu0 }
  0xe9   :  { %2297 = vpow2.f32 %v1925_v31  ;;  %340 = vst.msk [vmem:[#allocation4 + $0x38] sm:$0xff] %vm59_vm0, %v330_v35  ;;  %v322_v37 = vadd.f32 %v1898_v62, %v321_v36 }
  0xea   :  { %v531_v38 = vpop.f32.mrf.mxu0  ;;  %v690_v31 = vld [vmem:[#allocation4 + $0x8] sm:$0xff] }
  0xeb   :  { %338 = vst.msk [vmem:[#allocation4 + $0x28] sm:$0xff] %vm59_vm0, %v322_v37  ;;  %v532_v47 = vadd.f32 %v2596_v45, %v531_v38 }
  0xec   :  { %v2109_v40 = vpop.f32.mrf.mxu0 }
  0xee   :  { %v2296_v39 = vpop.eup %2295  ;;  %v534_v42 = vpop.f32.mrf.mxu0 }
  0xef   :  { %v544_v41 = vadd.f32 1.0, %v2296_v39 }
  0xf0   :  { %v2110_v43 = vpop.f32.mrf.mxu0 }
  0xf1   :  { %2299 = vrcp.f32 %v544_v41  ;;  %v837_v43 = vld [vmem:[#allocation2 + $0x10] sm:$0xff] }
  0xf6   :  { %v2298_v44 = vpop.eup %2297 }
  0xf7   :  { %v551_v46 = vadd.f32 1.0, %v2298_v44 }
  0xf9   :  { %2301 = vrcp.f32 %v551_v46 }
  0xfe   :  { %v2300_v48 = vpop.eup %2299 }
  0xff   :  { %v554_v49 = vmul.f32 %v2300_v48, %v532_v47 }
 0x101   :  { %v555_v51 = vadd.f32 %v554_v49, %v539_v50 }
 0x103   :  { %2303 = vtanh.f32 %v555_v51 }
 0x106   :  { %v2302_v52 = vpop.eup %2301 }
 0x107   :  { %v557_v53 = vsub.f32 1.0, %v2302_v52  ;;  %v559_v57 = vmul.f32 0.0, %v2302_v52 }
 0x110   :  { %v2304_v54 = vpop.eup %2303 }
 0x111   :  { %v558_v55 = vmul.f32 %v2304_v54, %v557_v53  ;;  %v839_v54 = vld [vmem:[#allocation3 + $0x10] sm:$0xff] }
 0x113   :  { %v560_v58 = vadd.f32 %v559_v57, %v558_v55 }
 0x115   :  { %v561_v59 = vpack.c.bf16 %v560_v58, %v560_v58 }
 0x117   :  { %2116 = vmatmul.mubr.msk.bf16.vlgmr.msra.gmra.mxu1 %vm59_vm0, %v561_v59  ;;  %2124 = vmatmul.mubr.msk.bf16.vlgmr.msra.gmra.mxu0 %vm59_vm0, %v561_v59 }
 0x118   :  { %2128 = vmatpush3.bf16.msra.mxu1 %v2509_v22  ;;  %2131 = vmatprep.mubr.msk.bf16.mxu1 %vm2394_vm1, %v2393_v14 }
 0x119   :  { %2129 = vmatprep.subr.bf16.mxu1 %v2393_v14  ;;  %2136 = vmatpush3.bf16.msra.mxu0 %v2466_v12 }
 0x11a   :  { %2137 = vmatprep.subr.bf16.mxu0 %v2393_v14  ;;  %2139 = vmatprep.mubr.msk.bf16.mxu0 %vm2394_vm1, %v2393_v14 }
 0x11c   :  { %2130 = vmatpush3.bf16.msra.mxu1 %v2526_v25 }
 0x11d   :  { %2143 = vmatprep.subr.bf16.mxu1 %v2393_v14  ;;  %2138 = vmatpush3.bf16.msra.mxu0 %v2485_v18 }
 0x11e   :  { %2151 = vmatprep.subr.bf16.mxu0 %v2393_v14 }
 0x11f   :  { %2132 = vmatmul.mubr.msk.bf16.vlgmr.msra.gmra.mxu1 %vm59_vm0, %v561_v59 }
 0x120   :  { %2144 = vmatpush3.bf16.msra.mxu1 %v2504_v21  ;;  %2147 = vmatprep.mubr.msk.bf16.mxu1 %vm2394_vm1, %v2393_v14 }
 0x121   :  { %2145 = vmatprep.subr.bf16.mxu1 %v2393_v14 }
 0x124   :  { %2146 = vmatpush3.bf16.msra.mxu1 %v2515_v24 }
 0x125   :  { %2159 = vmatprep.subr.bf16.mxu1 %v2393_v14 }
 0x1d7   :  { %v599_v60 = vpop.f32.mrf.mxu1  ;;  %v639_v61 = vpop.f32.mrf.mxu0 }
 0x1d8   :  { %v600_v62 = vadd.f32 %v2568_v56, %v599_v60  ;;  %v640_v6 = vadd.f32 %v2583_v10, %v639_v61 }
 0x1d9   :  { %v2117_v0 = vpop.f32.mrf.mxu1  ;;  %v2125_v1 = vpop.f32.mrf.mxu0 }
 0x1da   :  { %v691_v2 = vadd.f32 %v686_v63, %v600_v62  ;;  %v698_v13 = vadd.f32 %v688_v9, %v640_v6 }
 0x1db   :  { %v602_v3 = vpop.f32.mrf.mxu1  ;;  %v642_v4 = vpop.f32.mrf.mxu0 }
 0x1dc   :  { %v1929_v5 = vmul.f32 -1.442695, %v691_v2  ;;  %v1930_v17 = vmul.f32 -1.442695, %v698_v13 }
 0x1dd   :  { %v2118_v7 = vpop.f32.mrf.mxu1  ;;  %v2126_v8 = vpop.f32.mrf.mxu0 }
 0x1de   :  { %2305 = vpow2.f32 %v1929_v5  ;;  %v841_v5 = vld [vmem:[#allocation4 + $0x10] sm:$0xff] }
 0x1df   :  { %v679_v11 = vpop.f32.mrf.mxu1  ;;  %2307 = vpow2.f32 %v1930_v17 }
 0x1e0   :  { %v680_v28 = vadd.f32 %v2596_v45, %v679_v11 }
 0x1e1   :  { %v2133_v15 = vpop.f32.mrf.mxu1 }
 0x1e3   :  { %v682_v16 = vpop.f32.mrf.mxu1 }
 0x1e5   :  { %v2134_v19 = vpop.f32.mrf.mxu1 }
 0x1eb   :  { %v2306_v20 = vpop.eup %2305 }
 0x1ec   :  { %v695_v23 = vadd.f32 1.0, %v2306_v20  ;;  %v2308_v26 = vpop.eup %2307 }
 0x1ed   :  { %v702_v27 = vadd.f32 1.0, %v2308_v26 }
 0x1ee   :  { %2309 = vrcp.f32 %v695_v23  ;;  %v988_v23 = vld [vmem:[#allocation2 + $0x18] sm:$0xff] }
 0x1ef   :  { %2311 = vrcp.f32 %v702_v27 }
 0x1fb   :  { %v2310_v29 = vpop.eup %2309 }
 0x1fc   :  { %v705_v30 = vmul.f32 %v2310_v29, %v680_v28  ;;  %v2312_v33 = vpop.eup %2311 }
 0x1fd   :  { %v708_v34 = vsub.f32 1.0, %v2312_v33  ;;  %v710_v37 = vmul.f32 %v2312_v33, %v560_v58 }
 0x1fe   :  { %v706_v32 = vadd.f32 %v705_v30, %v690_v31 }
 0x200   :  { %2313 = vtanh.f32 %v706_v32 }
 0x20d   :  { %v2314_v35 = vpop.eup %2313 }
 0x20e   :  { %v709_v36 = vmul.f32 %v2314_v35, %v708_v34  ;;  %v990_v35 = vld [vmem:[#allocation3 + $0x18] sm:$0xff] }
 0x210   :  { %v711_v38 = vadd.f32 %v710_v37, %v709_v36 }
 0x212   :  { %v712_v39 = vpack.c.bf16 %v711_v38, %v711_v38 }
 0x214   :  { %2140 = vmatmul.mubr.msk.bf16.vlgmr.msra.gmra.mxu0 %vm59_vm0, %v712_v39  ;;  %2148 = vmatmul.mubr.msk.bf16.vlgmr.msra.gmra.mxu1 %vm59_vm0, %v712_v39 }
 0x215   :  { %2152 = vmatpush3.bf16.msra.mxu0 %v2509_v22  ;;  %2155 = vmatprep.mubr.msk.bf16.mxu0 %vm2394_vm1, %v2393_v14 }
 0x216   :  { %2153 = vmatprep.subr.bf16.mxu0 %v2393_v14  ;;  %2160 = vmatpush3.bf16.msra.mxu1 %v2466_v12 }
 0x217   :  { %2161 = vmatprep.subr.bf16.mxu1 %v2393_v14  ;;  %2163 = vmatprep.mubr.msk.bf16.mxu1 %vm2394_vm1, %v2393_v14 }
 0x219   :  { %2154 = vmatpush3.bf16.msra.mxu0 %v2526_v25 }
 0x21a   :  { %2167 = vmatprep.subr.bf16.mxu0 %v2393_v14  ;;  %2162 = vmatpush3.bf16.msra.mxu1 %v2485_v18 }
 0x21b   :  { %2175 = vmatprep.subr.bf16.mxu1 %v2393_v14 }
 0x21c   :  { %2156 = vmatmul.mubr.msk.bf16.vlgmr.msra.gmra.mxu0 %vm59_vm0, %v712_v39 }
 0x21d   :  { %2168 = vmatpush3.bf16.msra.mxu0 %v2504_v21  ;;  %2171 = vmatprep.mubr.msk.bf16.mxu0 %vm2394_vm1, %v2393_v14 }
 0x21e   :  { %2169 = vmatprep.subr.bf16.mxu0 %v2393_v14 }
 0x221   :  { %2170 = vmatpush3.bf16.msra.mxu0 %v2515_v24 }
 0x222   :  { %2183 = vmatprep.subr.bf16.mxu0 %v2393_v14 }
 0x2d4   :  { %v750_v40 = vpop.f32.mrf.mxu0  ;;  %v790_v41 = vpop.f32.mrf.mxu1 }
 0x2d5   :  { %v751_v42 = vadd.f32 %v2568_v56, %v750_v40  ;;  %v791_v51 = vadd.f32 %v2583_v10, %v790_v41 }
 0x2d6   :  { %v2141_v44 = vpop.f32.mrf.mxu0  ;;  %v2149_v46 = vpop.f32.mrf.mxu1 }
 0x2d7   :  { %v842_v47 = vadd.f32 %v837_v43, %v751_v42  ;;  %v849_v57 = vadd.f32 %v839_v54, %v791_v51 }
 0x2d8   :  { %v753_v48 = vpop.f32.mrf.mxu0  ;;  %v793_v49 = vpop.f32.mrf.mxu1 }
 0x2d9   :  { %v1934_v50 = vmul.f32 -1.442695, %v842_v47  ;;  %v1935_v60 = vmul.f32 -1.442695, %v849_v57 }
 0x2da   :  { %v2142_v52 = vpop.f32.mrf.mxu0  ;;  %v2150_v53 = vpop.f32.mrf.mxu1 }
 0x2db   :  { %2315 = vpow2.f32 %v1934_v50  ;;  %v992_v50 = vld [vmem:[#allocation4 + $0x18] sm:$0xff] }
 0x2dc   :  { %v830_v55 = vpop.f32.mrf.mxu0  ;;  %2317 = vpow2.f32 %v1935_v60 }
 0x2dd   :  { %v831_v2 = vadd.f32 %v2596_v45, %v830_v55 }
 0x2de   :  { %v2157_v58 = vpop.f32.mrf.mxu0 }
 0x2e0   :  { %v833_v59 = vpop.f32.mrf.mxu0 }
 0x2e2   :  { %v2158_v61 = vpop.f32.mrf.mxu0 }
 0x2e8   :  { %v2316_v62 = vpop.eup %2315 }
 0x2e9   :  { %v846_v63 = vadd.f32 1.0, %v2316_v62  ;;  %v2318_v0 = vpop.eup %2317 }
 0x2ea   :  { %v853_v1 = vadd.f32 1.0, %v2318_v0 }
 0x2eb   :  { %2319 = vrcp.f32 %v846_v63  ;;  %v1139_v63 = vld [vmem:[#allocation2 + $0x20] sm:$0xff] }
 0x2ec   :  { %2321 = vrcp.f32 %v853_v1 }
 0x2f8   :  { %v2320_v3 = vpop.eup %2319 }
 0x2f9   :  { %v856_v4 = vmul.f32 %v2320_v3, %v831_v2  ;;  %v2322_v7 = vpop.eup %2321 }
 0x2fa   :  { %v859_v8 = vsub.f32 1.0, %v2322_v7  ;;  %v861_v13 = vmul.f32 %v2322_v7, %v711_v38 }
 0x2fb   :  { %v857_v6 = vadd.f32 %v856_v4, %v841_v5 }
 0x2fd   :  { %2323 = vtanh.f32 %v857_v6 }
 0x30a   :  { %v2324_v9 = vpop.eup %2323 }
 0x30b   :  { %v860_v11 = vmul.f32 %v2324_v9, %v859_v8  ;;  %v1141_v9 = vld [vmem:[#allocation3 + $0x20] sm:$0xff] }
 0x30d   :  { %v862_v15 = vadd.f32 %v861_v13, %v860_v11 }
 0x30f   :  { %v863_v16 = vpack.c.bf16 %v862_v15, %v862_v15 }
 0x311   :  { %2164 = vmatmul.mubr.msk.bf16.vlgmr.msra.gmra.mxu1 %vm59_vm0, %v863_v16  ;;  %2172 = vmatmul.mubr.msk.bf16.vlgmr.msra.gmra.mxu0 %vm59_vm0, %v863_v16 }
 0x312   :  { %2176 = vmatpush3.bf16.msra.mxu1 %v2509_v22  ;;  %2179 = vmatprep.mubr.msk.bf16.mxu1 %vm2394_vm1, %v2393_v14 }
 0x313   :  { %2177 = vmatprep.subr.bf16.mxu1 %v2393_v14  ;;  %2184 = vmatpush3.bf16.msra.mxu0 %v2466_v12 }
 0x314   :  { %2185 = vmatprep.subr.bf16.mxu0 %v2393_v14  ;;  %2187 = vmatprep.mubr.msk.bf16.mxu0 %vm2394_vm1, %v2393_v14 }
 0x316   :  { %2178 = vmatpush3.bf16.msra.mxu1 %v2526_v25 }
 0x317   :  { %2191 = vmatprep.subr.bf16.mxu1 %v2393_v14  ;;  %2186 = vmatpush3.bf16.msra.mxu0 %v2485_v18 }
 0x318   :  { %2199 = vmatprep.subr.bf16.mxu0 %v2393_v14 }
 0x319   :  { %2180 = vmatmul.mubr.msk.bf16.vlgmr.msra.gmra.mxu1 %vm59_vm0, %v863_v16 }
 0x31a   :  { %2192 = vmatpush3.bf16.msra.mxu1 %v2504_v21  ;;  %2195 = vmatprep.mubr.msk.bf16.mxu1 %vm2394_vm1, %v2393_v14 }
 0x31b   :  { %2193 = vmatprep.subr.bf16.mxu1 %v2393_v14 }
 0x31e   :  { %2194 = vmatpush3.bf16.msra.mxu1 %v2515_v24 }
 0x31f   :  { %2207 = vmatprep.subr.bf16.mxu1 %v2393_v14 }
 0x3d1   :  { %v901_v17 = vpop.f32.mrf.mxu1  ;;  %v941_v19 = vpop.f32.mrf.mxu0 }
 0x3d2   :  { %v902_v20 = vadd.f32 %v2568_v56, %v901_v17  ;;  %v942_v32 = vadd.f32 %v2583_v10, %v941_v19 }
 0x3d3   :  { %v2165_v26 = vpop.f32.mrf.mxu1  ;;  %v2173_v27 = vpop.f32.mrf.mxu0 }
 0x3d4   :  { %v993_v28 = vadd.f32 %v988_v23, %v902_v20  ;;  %v1000_v37 = vadd.f32 %v990_v35, %v942_v32 }
 0x3d5   :  { %v904_v29 = vpop.f32.mrf.mxu1  ;;  %v944_v30 = vpop.f32.mrf.mxu0 }
 0x3d6   :  { %v1939_v31 = vmul.f32 -1.442695, %v993_v28  ;;  %v1940_v40 = vmul.f32 -1.442695, %v1000_v37 }
 0x3d7   :  { %v2166_v33 = vpop.f32.mrf.mxu1  ;;  %v2174_v34 = vpop.f32.mrf.mxu0 }
 0x3d8   :  { %2325 = vpow2.f32 %v1939_v31  ;;  %v1143_v31 = vld [vmem:[#allocation4 + $0x20] sm:$0xff] }
 0x3d9   :  { %v981_v36 = vpop.f32.mrf.mxu1  ;;  %2327 = vpow2.f32 %v1940_v40 }
 0x3da   :  { %v982_v47 = vadd.f32 %v2596_v45, %v981_v36 }
 0x3db   :  { %v2181_v38 = vpop.f32.mrf.mxu1 }
 0x3dd   :  { %v984_v39 = vpop.f32.mrf.mxu1 }
 0x3df   :  { %v2182_v41 = vpop.f32.mrf.mxu1 }
 0x3e5   :  { %v2326_v42 = vpop.eup %2325 }
 0x3e6   :  { %v997_v43 = vadd.f32 1.0, %v2326_v42  ;;  %v2328_v44 = vpop.eup %2327 }
 0x3e7   :  { %v1004_v46 = vadd.f32 1.0, %v2328_v44 }
 0x3e8   :  { %2329 = vrcp.f32 %v997_v43  ;;  %v1290_v43 = vld [vmem:[#allocation2 + $0x28] sm:$0xff] }
 0x3e9   :  { %2331 = vrcp.f32 %v1004_v46 }
 0x3f5   :  { %v2330_v48 = vpop.eup %2329 }
 0x3f6   :  { %v1007_v49 = vmul.f32 %v2330_v48, %v982_v47  ;;  %v2332_v52 = vpop.eup %2331 }
 0x3f7   :  { %v1010_v53 = vsub.f32 1.0, %v2332_v52  ;;  %v1012_v57 = vmul.f32 %v2332_v52, %v862_v15 }
 0x3f8   :  { %v1008_v51 = vadd.f32 %v1007_v49, %v992_v50 }
 0x3fa   :  { %2333 = vtanh.f32 %v1008_v51 }
 0x407   :  { %v2334_v54 = vpop.eup %2333 }
 0x408   :  { %v1011_v55 = vmul.f32 %v2334_v54, %v1010_v53  ;;  %v1292_v54 = vld [vmem:[#allocation3 + $0x28] sm:$0xff] }
 0x40a   :  { %v1013_v58 = vadd.f32 %v1012_v57, %v1011_v55 }
 0x40c   :  { %v1014_v59 = vpack.c.bf16 %v1013_v58, %v1013_v58 }
 0x40e   :  { %2188 = vmatmul.mubr.msk.bf16.vlgmr.msra.gmra.mxu0 %vm59_vm0, %v1014_v59  ;;  %2196 = vmatmul.mubr.msk.bf16.vlgmr.msra.gmra.mxu1 %vm59_vm0, %v1014_v59 }
 0x40f   :  { %2200 = vmatpush3.bf16.msra.mxu0 %v2509_v22  ;;  %2203 = vmatprep.mubr.msk.bf16.mxu0 %vm2394_vm1, %v2393_v14 }
 0x410   :  { %2201 = vmatprep.subr.bf16.mxu0 %v2393_v14  ;;  %2208 = vmatpush3.bf16.msra.mxu1 %v2466_v12 }
 0x411   :  { %2209 = vmatprep.subr.bf16.mxu1 %v2393_v14  ;;  %2211 = vmatprep.mubr.msk.bf16.mxu1 %vm2394_vm1, %v2393_v14 }
 0x413   :  { %2202 = vmatpush3.bf16.msra.mxu0 %v2526_v25 }
 0x414   :  { %2215 = vmatprep.subr.bf16.mxu0 %v2393_v14  ;;  %2210 = vmatpush3.bf16.msra.mxu1 %v2485_v18 }
 0x415   :  { %2223 = vmatprep.subr.bf16.mxu1 %v2393_v14 }
 0x416   :  { %2204 = vmatmul.mubr.msk.bf16.vlgmr.msra.gmra.mxu0 %vm59_vm0, %v1014_v59 }
 0x417   :  { %2216 = vmatpush3.bf16.msra.mxu0 %v2504_v21  ;;  %2219 = vmatprep.mubr.msk.bf16.mxu0 %vm2394_vm1, %v2393_v14 }
 0x418   :  { %2217 = vmatprep.subr.bf16.mxu0 %v2393_v14 }
 0x41b   :  { %2218 = vmatpush3.bf16.msra.mxu0 %v2515_v24 }
 0x41c   :  { %2231 = vmatprep.subr.bf16.mxu0 %v2393_v14 }
 0x4ce   :  { %v1052_v60 = vpop.f32.mrf.mxu0  ;;  %v1092_v61 = vpop.f32.mrf.mxu1 }
 0x4cf   :  { %v1053_v62 = vadd.f32 %v2568_v56, %v1052_v60  ;;  %v1093_v6 = vadd.f32 %v2583_v10, %v1092_v61 }
 0x4d0   :  { %v2189_v0 = vpop.f32.mrf.mxu0  ;;  %v2197_v1 = vpop.f32.mrf.mxu1 }
 0x4d1   :  { %v1144_v2 = vadd.f32 %v1139_v63, %v1053_v62  ;;  %v1151_v13 = vadd.f32 %v1141_v9, %v1093_v6 }
 0x4d2   :  { %v1055_v3 = vpop.f32.mrf.mxu0  ;;  %v1095_v4 = vpop.f32.mrf.mxu1 }
 0x4d3   :  { %v1944_v5 = vmul.f32 -1.442695, %v1144_v2  ;;  %v1945_v17 = vmul.f32 -1.442695, %v1151_v13 }
 0x4d4   :  { %v2190_v7 = vpop.f32.mrf.mxu0  ;;  %v2198_v8 = vpop.f32.mrf.mxu1 }
 0x4d5   :  { %2335 = vpow2.f32 %v1944_v5  ;;  %v1294_v5 = vld [vmem:[#allocation4 + $0x28] sm:$0xff] }
 0x4d6   :  { %v1132_v11 = vpop.f32.mrf.mxu0  ;;  %2337 = vpow2.f32 %v1945_v17 }
 0x4d7   :  { %v1133_v28 = vadd.f32 %v2596_v45, %v1132_v11 }
 0x4d8   :  { %v2205_v15 = vpop.f32.mrf.mxu0 }
 0x4da   :  { %v1135_v16 = vpop.f32.mrf.mxu0 }
 0x4dc   :  { %v2206_v19 = vpop.f32.mrf.mxu0 }
 0x4e2   :  { %v2336_v20 = vpop.eup %2335 }
 0x4e3   :  { %v1148_v23 = vadd.f32 1.0, %v2336_v20  ;;  %v2338_v26 = vpop.eup %2337  ;;  %v1441_v20 = vld [vmem:[#allocation2 + $0x30] sm:$0xff] }
 0x4e4   :  { %v1155_v27 = vadd.f32 1.0, %v2338_v26 }
 0x4e5   :  { %2339 = vrcp.f32 %v1148_v23 }
 0x4e6   :  { %2341 = vrcp.f32 %v1155_v27 }
 0x4f2   :  { %v2340_v29 = vpop.eup %2339 }
 0x4f3   :  { %v1158_v30 = vmul.f32 %v2340_v29, %v1133_v28  ;;  %v2342_v33 = vpop.eup %2341 }
 0x4f4   :  { %v1161_v34 = vsub.f32 1.0, %v2342_v33  ;;  %v1163_v37 = vmul.f32 %v2342_v33, %v1013_v58 }
 0x4f5   :  { %v1159_v32 = vadd.f32 %v1158_v30, %v1143_v31 }
 0x4f7   :  { %2343 = vtanh.f32 %v1159_v32  ;;  %v1443_v32 = vld [vmem:[#allocation3 + $0x30] sm:$0xff] }
 0x504   :  { %v2344_v35 = vpop.eup %2343 }
 0x505   :  { %v1162_v36 = vmul.f32 %v2344_v35, %v1161_v34 }
 0x507   :  { %v1164_v38 = vadd.f32 %v1163_v37, %v1162_v36 }
 0x509   :  { %v1165_v39 = vpack.c.bf16 %v1164_v38, %v1164_v38 }
 0x50b   :  { %2212 = vmatmul.mubr.msk.bf16.vlgmr.msra.gmra.mxu1 %vm59_vm0, %v1165_v39  ;;  %2220 = vmatmul.mubr.msk.bf16.vlgmr.msra.gmra.mxu0 %vm59_vm0, %v1165_v39 }
 0x50c   :  { %2224 = vmatpush3.bf16.msra.mxu1 %v2509_v22  ;;  %2227 = vmatprep.mubr.msk.bf16.mxu1 %vm2394_vm1, %v2393_v14 }
 0x50d   :  { %2225 = vmatprep.subr.bf16.mxu1 %v2393_v14  ;;  %2232 = vmatpush3.bf16.msra.mxu0 %v2466_v12 }
 0x50e   :  { %2233 = vmatprep.subr.bf16.mxu0 %v2393_v14  ;;  %2235 = vmatprep.mubr.msk.bf16.mxu0 %vm2394_vm1, %v2393_v14 }
 0x510   :  { %2226 = vmatpush3.bf16.msra.mxu1 %v2526_v25 }
 0x511   :  { %2239 = vmatprep.subr.bf16.mxu1 %v2393_v14  ;;  %2234 = vmatpush3.bf16.msra.mxu0 %v2485_v18 }
 0x512   :  { %2247 = vmatprep.subr.bf16.mxu0 %v2393_v14 }
 0x513   :  { %2228 = vmatmul.mubr.msk.bf16.vlgmr.msra.gmra.mxu1 %vm59_vm0, %v1165_v39 }
 0x514   :  { %2240 = vmatpush3.bf16.msra.mxu1 %v2504_v21  ;;  %2243 = vmatprep.mubr.msk.bf16.mxu1 %vm2394_vm1, %v2393_v14 }
 0x515   :  { %2241 = vmatprep.subr.bf16.mxu1 %v2393_v14 }
 0x518   :  { %2242 = vmatpush3.bf16.msra.mxu1 %v2515_v24 }
 0x519   :  { %2255 = vmatprep.subr.bf16.mxu1 %v2393_v14 }
 0x5cb   :  { %v1203_v40 = vpop.f32.mrf.mxu1  ;;  %v1243_v41 = vpop.f32.mrf.mxu0 }
 0x5cc   :  { %v1204_v42 = vadd.f32 %v2568_v56, %v1203_v40  ;;  %v1244_v51 = vadd.f32 %v2583_v10, %v1243_v41 }
 0x5cd   :  { %v2213_v44 = vpop.f32.mrf.mxu1  ;;  %v2221_v46 = vpop.f32.mrf.mxu0 }
 0x5ce   :  { %v1295_v47 = vadd.f32 %v1290_v43, %v1204_v42  ;;  %v1302_v57 = vadd.f32 %v1292_v54, %v1244_v51  ;;  %v1445_v46 = vld [vmem:[#allocation4 + $0x30] sm:$0xff] }
 0x5cf   :  { %v1206_v48 = vpop.f32.mrf.mxu1  ;;  %v1246_v49 = vpop.f32.mrf.mxu0 }
 0x5d0   :  { %v1949_v50 = vmul.f32 -1.442695, %v1295_v47  ;;  %v1950_v60 = vmul.f32 -1.442695, %v1302_v57 }
 0x5d1   :  { %v2214_v52 = vpop.f32.mrf.mxu1  ;;  %v2222_v53 = vpop.f32.mrf.mxu0 }
 0x5d2   :  { %2345 = vpow2.f32 %v1949_v50 }
 0x5d3   :  { %v1283_v55 = vpop.f32.mrf.mxu1  ;;  %2347 = vpow2.f32 %v1950_v60 }
 0x5d4   :  { %v1284_v2 = vadd.f32 %v2596_v45, %v1283_v55  ;;  %v2757_v55 = vld [vmem:[%s2857_s1 + $0x8] sm:$0xff] }
 0x5d5   :  { %v2229_v58 = vpop.f32.mrf.mxu1  ;;  %v1634_v57 = vmul.f32 %v2757_v55, %v2757_v55 }
 0x5d7   :  { %v1286_v59 = vpop.f32.mrf.mxu1  ;;  %v1644_v58 = vsel %vm59_vm0, %v1634_v57, 0.0 }
 0x5d8   :  { %1645 = vadd.xlane.f32.xlu1 %v1644_v58  ;;  %v2773_v59 = vld [vmem:[%s2857_s1 + $0x20] sm:$0xff] }
 0x5d9   :  { %v2230_v61 = vpop.f32.mrf.mxu1  ;;  %v1637_v60 = vmul.f32 %v2773_v59, %v2773_v59 }
 0x5db   :  { %v1653_v61 = vsel %vm59_vm0, %v1637_v60, 0.0 }
 0x5df   :  { %v2346_v62 = vpop.eup %2345 }
 0x5e0   :  { %v1299_v63 = vadd.f32 1.0, %v2346_v62  ;;  %v2348_v0 = vpop.eup %2347  ;;  %v2781_v62 = vld [vmem:[%s2857_s1 + $0x30] sm:$0xff] }
 0x5e1   :  { %v1306_v1 = vadd.f32 1.0, %v2348_v0 }
 0x5e2   :  { %2349 = vrcp.f32 %v1299_v63  ;;  %v1639_v63 = vmul.f32 %v2781_v62, %v2781_v62 }
 0x5e3   :  { %2351 = vrcp.f32 %v1306_v1 }
 0x5e4   :  { %v1659_v0 = vsel %vm59_vm0, %v1639_v63, 0.0 }
 0x5ef   :  { %v2350_v3 = vpop.eup %2349 }
 0x5f0   :  { %v1309_v4 = vmul.f32 %v2350_v3, %v1284_v2  ;;  %v2352_v7 = vpop.eup %2351 }
 0x5f1   :  { %v1312_v8 = vsub.f32 1.0, %v2352_v7  ;;  %v1314_v13 = vmul.f32 %v2352_v7, %v1164_v38 }
 0x5f2   :  { %v1310_v6 = vadd.f32 %v1309_v4, %v1294_v5  ;;  %v1592_v4 = vld [vmem:[#allocation2 + $0x38] sm:$0xff] }
 0x5f4   :  { %2353 = vtanh.f32 %v1310_v6 }
 0x601   :  { %v2354_v9 = vpop.eup %2353 }
 0x602   :  { %v1313_v11 = vmul.f32 %v2354_v9, %v1312_v8 }
 0x604   :  { %v1315_v15 = vadd.f32 %v1314_v13, %v1313_v11 }
 0x606   :  { %v1316_v16 = vpack.c.bf16 %v1315_v15, %v1315_v15 }
 0x608   :  { %2236 = vmatmul.mubr.msk.bf16.vlgmr.msra.gmra.mxu0 %vm59_vm0, %v1316_v16  ;;  %2244 = vmatmul.mubr.msk.bf16.vlgmr.msra.gmra.mxu1 %vm59_vm0, %v1316_v16 }
 0x609   :  { %2248 = vmatpush3.bf16.msra.mxu0 %v2509_v22  ;;  %2251 = vmatprep.mubr.msk.bf16.mxu0 %vm2394_vm1, %v2393_v14 }
 0x60a   :  { %2249 = vmatprep.subr.bf16.mxu0 %v2393_v14  ;;  %2256 = vmatpush3.bf16.msra.mxu1 %v2466_v12 }
 0x60b   :  { %2257 = vmatprep.subr.bf16.mxu1 %v2393_v14  ;;  %2259 = vmatprep.mubr.msk.bf16.mxu1 %vm2394_vm1, %v2393_v14 }
 0x60d   :  { %2250 = vmatpush3.bf16.msra.mxu0 %v2526_v25 }
 0x60e   :  { %2263 = vmatprep.subr.bf16.mxu0 %v2393_v14  ;;  %2258 = vmatpush3.bf16.msra.mxu1 %v2485_v18 }
 0x60f   :  { %2271 = vmatprep.subr.bf16.mxu1 %v2393_v14 }
 0x610   :  { %2252 = vmatmul.mubr.msk.bf16.vlgmr.msra.gmra.mxu0 %vm59_vm0, %v1316_v16 }
 0x611   :  { %2264 = vmatpush3.bf16.msra.mxu0 %v2504_v21  ;;  %2267 = vmatprep.mubr.msk.bf16.mxu0 %vm2394_vm1, %v2393_v14 }
 0x612   :  { %2265 = vmatprep.subr.bf16.mxu0 %v2393_v14 }
 0x615   :  { %2266 = vmatpush3.bf16.msra.mxu0 %v2515_v24 }
 0x661   :  { %v1646_v58 = vpop.xlane.xlu1 %1645 }
 0x662   :  { %v1666_v60 = vmax.f32 %v1646_v58, 1e-24 }
 0x6c8   :  { %v1354_v12 = vpop.f32.mrf.mxu0  ;;  %v1394_v17 = vpop.f32.mrf.mxu1 }
 0x6c9   :  { %v1355_v19 = vadd.f32 %v2568_v56, %v1354_v12  ;;  %v1395_v21 = vadd.f32 %v2583_v10, %v1394_v17  ;;  %v1594_v12 = vld [vmem:[#allocation3 + $0x38] sm:$0xff] }
 0x6ca   :  { %v2237_v23 = vpop.f32.mrf.mxu0  ;;  %v2245_v18 = vpop.f32.mrf.mxu1 }
 0x6cb   :  { %v1446_v26 = vadd.f32 %v1441_v20, %v1355_v19  ;;  %v1453_v34 = vadd.f32 %v1443_v32, %v1395_v21 }
 0x6cc   :  { %v1357_v27 = vpop.f32.mrf.mxu0  ;;  %v1397_v28 = vpop.f32.mrf.mxu1 }
 0x6cd   :  { %v1954_v29 = vmul.f32 -1.442695, %v1446_v26  ;;  %v1955_v36 = vmul.f32 -1.442695, %v1453_v34 }
 0x6ce   :  { %v2238_v30 = vpop.f32.mrf.mxu0  ;;  %v2246_v31 = vpop.f32.mrf.mxu1 }
 0x6cf   :  { %2355 = vpow2.f32 %v1954_v29  ;;  %v1596_v31 = vld [vmem:[#allocation4 + $0x38] sm:$0xff] }
 0x6d0   :  { %v1434_v33 = vpop.f32.mrf.mxu0  ;;  %2357 = vpow2.f32 %v1955_v36 }
 0x6d1   :  { %v1435_v42 = vadd.f32 %v2596_v45, %v1434_v33 }
 0x6d2   :  { %v2253_v24 = vpop.f32.mrf.mxu0 }
 0x6d4   :  { %v1437_v35 = vpop.f32.mrf.mxu0 }
 0x6d6   :  { %v2254_v37 = vpop.f32.mrf.mxu0 }
 0x6d7   :  { %v2793_v37 = vld [vmem:[%s2857_s1] sm:$0xff] }
 0x6dc   :  { %v2356_v38 = vpop.eup %2355 }
 0x6dd   :  { %v1450_v39 = vadd.f32 1.0, %v2356_v38  ;;  %v2358_v40 = vpop.eup %2357 }
 0x6de   :  { %v1457_v41 = vadd.f32 1.0, %v2358_v40  ;;  %v2800_v40 = vld [vmem:[%s2857_s1 + $0x18] sm:$0xff] }
 0x6df   :  { %2359 = vrcp.f32 %v1450_v39 }
 0x6e0   :  { %2361 = vrcp.f32 %v1457_v41 }
 0x6ec   :  { %v2360_v43 = vpop.eup %2359 }
 0x6ed   :  { %v1460_v44 = vmul.f32 %v2360_v43, %v1435_v42  ;;  %v2362_v48 = vpop.eup %2361  ;;  %v1636_v43 = vmul.f32 %v2800_v40, %v2800_v40 }
 0x6ee   :  { %v1463_v49 = vsub.f32 1.0, %v2362_v48  ;;  %v1465_v52 = vmul.f32 %v2362_v48, %v1315_v15  ;;  %v2817_v48 = vld [vmem:[%s2857_s1 + $0x38] sm:$0xff] }
 0x6ef   :  { %v1461_v47 = vadd.f32 %v1460_v44, %v1445_v46  ;;  %v2809_v44 = vld [vmem:[%s2857_s1 + $0x28] sm:$0xff]  ;;  %v1650_v46 = vsel %vm59_vm0, %v1636_v43, 0.0 }
 0x6f1   :  { %2363 = vtanh.f32 %v1461_v47  ;;  %v1638_v47 = vmul.f32 %v2809_v44, %v2809_v44 }
 0x6fe   :  { %v2364_v50 = vpop.eup %2363 }
 0x6ff   :  { %v1464_v51 = vmul.f32 %v2364_v50, %v1463_v49  ;;  %v1656_v49 = vsel %vm59_vm0, %v1638_v47, 0.0  ;;  %v1640_v50 = vmul.f32 %v2817_v48, %v2817_v48 }
 0x701   :  { %v2742_v53 = vadd.f32 %v1465_v52, %v1464_v51  ;;  %v1662_v51 = vsel %vm59_vm0, %v1640_v50, 0.0  ;;  %v1694_v52 = vlaneseq }
 0x703   :  { %v1467_v54 = vpack.c.bf16 %v2742_v53, %v2742_v53 }
 0x705   :  { %2260 = vmatmul.mubr.msk.bf16.vlgmr.msra.gmra.mxu1 %vm59_vm0, %v1467_v54  ;;  %2268 = vmatmul.mubr.msk.bf16.vlgmr.msra.gmra.mxu0 %vm59_vm0, %v1467_v54 }
 0x706   :  { %2272 = vmatpush3.bf16.msra.mxu1 %v2509_v22  ;;  %2275 = vmatprep.mubr.msk.bf16.mxu1 %vm2394_vm1, %v2393_v14  ;;  %v2765_v22 = vld [vmem:[%s2857_s1 + $0x10] sm:$0xff] }
 0x707   :  { %2273 = vmatprep.subr.bf16.mxu1 %v2393_v14  ;;  %v1635_v14 = vmul.f32 %v2765_v22, %v2765_v22 }
 0x70a   :  { %2274 = vmatpush3.bf16.msra.mxu1 %v2526_v25  ;;  %v1647_v25 = vsel %vm59_vm0, %v1635_v14, 0.0 }
 0x70b   :  { %1648 = vadd.xlane.f32.xlu1 %v1647_v25 }
 0x70d   :  { %2276 = vmatmul.mubr.msk.bf16.vlgmr.msra.gmra.mxu1 %vm59_vm0, %v1467_v54  ;;  %v1695_v54 = vshrl.u32 %v1694_v52, 7 }
 0x70f   :  { %1654 = vadd.xlane.f32.xlu1 %v1653_v61 }
 0x713   :  { %1660 = vadd.xlane.f32.xlu1 %v1659_v0 }
 0x794   :  { %v1649_v14 = vpop.xlane.xlu1 %1648 }
 0x795   :  { %v1667_v0 = vmax.f32 %v1649_v14, 1e-24 }
 0x798   :  { %v1655_v63 = vpop.xlane.xlu1 %1654 }
 0x7c5   :  { %v1505_v1 = vpop.f32.mrf.mxu1  ;;  %v1545_v2 = vpop.f32.mrf.mxu0 }
 0x7c6   :  { %v1506_v3 = vadd.f32 %v2568_v56, %v1505_v1  ;;  %v1546_v13 = vadd.f32 %v2583_v10, %v1545_v2 }
 0x7c7   :  { %v2261_v5 = vpop.f32.mrf.mxu1  ;;  %v2269_v6 = vpop.f32.mrf.mxu0 }
 0x7c8   :  { %v1597_v7 = vadd.f32 %v1592_v4, %v1506_v3  ;;  %v1604_v19 = vadd.f32 %v1594_v12, %v1546_v13  ;;  %v1669_v3 = vmax.f32 %v1655_v63, 1e-24  ;;  %v1661_v4 = vpop.xlane.xlu1 %1660  ;;  %v2396_v5 = vmov 1966171168  }
 0x7c9   :  { %v1508_v8 = vpop.f32.mrf.mxu1  ;;  %v1548_v9 = vpop.f32.mrf.mxu0  ;;  %v1692_v6 = vunpack.c.l.s4 %v2396_v5 }
 0x7ca   :  { %v1959_v11 = vmul.f32 -1.442695, %v1597_v7  ;;  %v1960_v18 = vmul.f32 -1.442695, %v1604_v19  ;;  %v1671_v9 = vmax.f32 %v1661_v4, 1e-24 }
 0x7cb   :  { %v2262_v15 = vpop.f32.mrf.mxu1  ;;  %v2270_v16 = vpop.f32.mrf.mxu0 }
 0x7cc   :  { %2365 = vpow2.f32 %v1959_v11  ;;  %v1693_v11 = vunpack.c.0.s8 %v1692_v6 }
 0x7cd   :  { %v1585_v17 = vpop.f32.mrf.mxu1  ;;  %2367 = vpow2.f32 %v1960_v18 }
 0x7ce   :  { %v1586_v21 = vadd.f32 %v2596_v45, %v1585_v17  ;;  %v1633_v45 = vmul.f32 %v2793_v37, %v2793_v37  ;;  %v1696_v16 = vsub.s32 %v1693_v11, %v1695_v54 }
 0x7cf   :  { %v2277_v20 = vpop.f32.mrf.mxu1 }
 0x7d0   :  { %v1641_v42 = vsel %vm59_vm0, %v1633_v45, 0.0 }
 0x7d1   :  { %v1588_v23 = vpop.f32.mrf.mxu1 }
 0x7d3   :  { %v2278_v26 = vpop.f32.mrf.mxu1 }
 0x7d9   :  { %v2366_v56 = vpop.eup %2365 }
 0x7da   :  { %v1601_v27 = vadd.f32 1.0, %v2366_v56  ;;  %v2368_v28 = vpop.eup %2367  ;;  %v1741_v56 = vsub.s32 0, %v1695_v54 }
 0x7db   :  { %v1608_v29 = vadd.f32 1.0, %v2368_v28 }
 0x7dc   :  { %2369 = vrcp.f32 %v1601_v27 }
 0x7dd   :  { %2371 = vrcp.f32 %v1608_v29 }
 0x7e9   :  { %v2370_v30 = vpop.eup %2369 }
 0x7ea   :  { %v1611_v10 = vmul.f32 %v2370_v30, %v1586_v21  ;;  %v2372_v33 = vpop.eup %2371 }
 0x7eb   :  { %v1614_v34 = vsub.f32 1.0, %v2372_v33  ;;  %v1616_v36 = vmul.f32 %v2372_v33, %v2742_v53  ;;  %v1820_v53 = vand.u32 127, %v1694_v52 }
 0x7ec   :  { %v1612_v32 = vadd.f32 %v1611_v10, %v1596_v31 }
 0x7ed   :  { %v2823_v57 = vsub.s32 %v1820_v53, %v1695_v54 }
 0x7ee   :  { %2373 = vtanh.f32 %v1612_v32 }
 0x7fb   :  { %v2374_v24 = vpop.eup %2373 }
 0x7fc   :  { %v1615_v35 = vmul.f32 %v2374_v24, %v1614_v34 }
 0x7fe   :  { %v1617_v38 = vadd.f32 %v1616_v36, %v1615_v35 }
 0x800   :  { %v1618_v39 = vmul.f32 %v1617_v38, %v1617_v38 }
 0x802   :  { %v1619_v41 = vsel %vm59_vm0, %v1618_v39, 0.0 }
 0x803   :  { %1620 = vadd.xlane.f32.xlu0 %v1619_v41 }
 0x807   :  { %1642 = vadd.xlane.f32.xlu0 %v1641_v42 }
 0x80b   :  { %1651 = vadd.xlane.f32.xlu0 %v1650_v46 }
 0x80f   :  { %1657 = vadd.xlane.f32.xlu0 %v1656_v49 }
 0x813   :  { %1663 = vadd.xlane.f32.xlu0 %v1662_v51 }
 0x88c   :  { %v1621_v25 = vpop.xlane.xlu0 %1620 }
 0x88d   :  { %v1622_v61 = vmax.f32 %v1621_v25, 1e-24 }
 0x88f   :  { %2375 = vrsqrt.f32 %v1622_v61 }
 0x890   :  { %v1643_v1 = vpop.xlane.xlu0 %1642  ;;  %2377 = vrsqrt.f32 %v1666_v60 }
 0x891   :  { %v1665_v2 = vmax.f32 %v1643_v1, 1e-24  ;;  %2379 = vrsqrt.f32 %v1667_v0 }
 0x893   :  { %2381 = vrsqrt.f32 %v1665_v2 }
 0x894   :  { %v1652_v7 = vpop.xlane.xlu0 %1651  ;;  %2383 = vrsqrt.f32 %v1669_v3 }
 0x895   :  { %v1668_v8 = vmax.f32 %v1652_v7, 1e-24 }
 0x897   :  { %2385 = vrsqrt.f32 %v1668_v8 }
 0x898   :  { %v1658_v13 = vpop.xlane.xlu0 %1657  ;;  %2387 = vrsqrt.f32 %v1671_v9 }
 0x899   :  { %v1670_v15 = vmax.f32 %v1658_v13, 1e-24 }
 0x89b   :  { %2389 = vrsqrt.f32 %v1670_v15 }
 0x89c   :  { %v2376_v12 = vpop.eup %2375  ;;  %v1664_v17 = vpop.xlane.xlu0 %1663 }
 0x89d   :  { %v1672_v19 = vmax.f32 %v1664_v17, 1e-24  ;;  %v1624_v20 = vmul.f32 %v2376_v12, %v1617_v38  ;;  %v2378_v23 = vpop.eup %2377 }
 0x89e   :  { %v2380_v18 = vpop.eup %2379  ;;  %v1682_v32 = vmul.f32 %v2378_v23, %v2757_v55 }
 0x89f   :  { %2391 = vrsqrt.f32 %v1672_v19  ;;  %v1697_v26 = vrot.slane %v1624_v20, %v1696_v16  ;;  %v1690_v27 = vcombine.high %v1624_v20, %v1624_v20  ;;  %v1683_v33 = vmul.f32 %v2380_v18, %v2765_v22 }
 0x8a0   :  { %v2382_v28 = vpop.eup %2381 }
 0x8a1   :  { %v1681_v29 = vmul.f32 %v2382_v28, %v2793_v37  ;;  %v1713_v21 = vrot.slane %v1697_v26, %v1696_v16  ;;  %v1705_v30 = vcombine.high %v1697_v26, %v1697_v26  ;;  %v1704_v10 = vrot.slane %v1690_v27, %v1696_v16  ;;  %v2384_v31 = vpop.eup %2383 }
 0x8a2   :  { %v1685_v43 = vmul.f32 %v2384_v31, %v2773_v59 }
 0x8a3   :  { %v1742_v34 = vrot.slane %v1713_v21, %v1741_v56  ;;  %v1727_v24 = vrot.slane %v1705_v30, %v1696_v16  ;;  %v1735_v35 = vcombine.high %v1713_v21, %v1713_v21  ;;  %v1720_v36 = vrot.slane %v1704_v10, %v1696_v16 }
 0x8a4   :  { %v2386_v38 = vpop.eup %2385  ;;  %v1706_v39 = vcombine.high %v1704_v10, %v1704_v10 }
 0x8a5   :  { %v1779_v45 = vmul.f32 %v1742_v34, %v1681_v29  ;;  %v1746_v41 = vrot.slane %v1727_v24, %v1741_v56  ;;  %v1750_v42 = vrot.slane %v1735_v35, %v1741_v56  ;;  %v1684_v37 = vmul.f32 %v2386_v38, %v2800_v40  ;;  %v2388_v50 = vpop.eup %2387 }
 0x8a6   :  { %v1737_v46 = vcombine.high %v1727_v24, %v1727_v24  ;;  %v1758_v47 = vrot.slane %v1720_v36, %v1741_v56  ;;  %v1734_v49 = vrot.slane %v1706_v39, %v1696_v16  ;;  %v1736_v52 = vcombine.high %v1720_v36, %v1720_v36 }
 0x8a7   :  { %v1787_v55 = vsel %vm59_vm0, %v1779_v45, 0.0  ;;  %v1780_v22 = vmul.f32 %v1746_v41, %v1682_v32  ;;  %v1781_v51 = vmul.f32 %v1750_v42, %v1683_v33  ;;  %v1687_v40 = vmul.f32 %v2388_v50, %v2781_v62 }
 0x8a8   :  { %v2390_v53 = vpop.eup %2389  ;;  %1788 = vadd.xlane.f32.xlu1 %v1787_v55  ;;  %v1754_v54 = vrot.slane %v1737_v46, %v1741_v56  ;;  %v1783_v25 = vmul.f32 %v1758_v47, %v1685_v43  ;;  %v1762_v61 = vrot.slane %v1734_v49, %v1741_v56  ;;  %v1766_v63 = vrot.slane %v1736_v52, %v1741_v56 }
 0x8a9   :  { %v1790_v58 = vsel %vm59_vm0, %v1780_v22, 0.0  ;;  %v1686_v14 = vmul.f32 %v2390_v53, %v2809_v44  ;;  %v1793_v60 = vsel %vm59_vm0, %v1781_v51, 0.0  ;;  %v1738_v0 = vcombine.high %v1734_v49, %v1734_v49 }
 0x8aa   :  { %1791 = vadd.xlane.f32.xlu0 %v1790_v58  ;;  %v1782_v59 = vmul.f32 %v1754_v54, %v1684_v37  ;;  %v1799_v44 = vsel %vm59_vm0, %v1783_v25, 0.0  ;;  %v1785_v5 = vmul.f32 %v1766_v63, %v1687_v40 }
 0x8ab   :  { %v1784_v3 = vmul.f32 %v1762_v61, %v1686_v14  ;;  %v1770_v6 = vrot.slane %v1738_v0, %v1741_v56 }
 0x8ac   :  { %v2392_v1 = vpop.eup %2391  ;;  %1794 = vadd.xlane.f32.xlu1 %v1793_v60  ;;  %v1796_v2 = vsel %vm59_vm0, %v1782_v59, 0.0  ;;  %v1805_v8 = vsel %vm59_vm0, %v1785_v5, 0.0 }
 0x8ad   :  { %v1688_v4 = vmul.f32 %v2392_v1, %v2817_v48  ;;  %v1802_v62 = vsel %vm59_vm0, %v1784_v3, 0.0 }
 0x8ae   :  { %1797 = vadd.xlane.f32.xlu0 %v1796_v2 }
 0x8af   :  { %v1786_v7 = vmul.f32 %v1770_v6, %v1688_v4 }
 0x8b0   :  { %1800 = vadd.xlane.f32.xlu1 %v1799_v44 }
 0x8b1   :  { %v1808_v9 = vsel %vm59_vm0, %v1786_v7, 0.0 }
 0x8b2   :  { %1803 = vadd.xlane.f32.xlu0 %v1802_v62 }
 0x8b4   :  { %1806 = vadd.xlane.f32.xlu1 %v1805_v8 }
 0x8b6   :  { %1809 = vadd.xlane.f32.xlu0 %v1808_v9 }
 0x931   :  { %v1789_v11 = vpop.xlane.xlu1 %1788 }
 0x932   :  { %v1824_v48 = vrot.slane %v1789_v11, %v2823_v57 }
 0x933   :  { %v1792_v13 = vpop.xlane.xlu0 %1791 }
 0x934   :  { %v1828_v15 = vrot.slane %v1792_v13, %v2823_v57 }
 0x935   :  { %v1795_v16 = vpop.xlane.xlu1 %1794 }
 0x936   :  { %v1854_v12 = vsel %vm1853_vm2, %v1828_v15, %v1824_v48  ;;  %v1832_v17 = vrot.slane %v1795_v16, %v2823_v57 }
 0x937   :  { %v1798_v19 = vpop.xlane.xlu0 %1797 }
 0x938   :  { %v1856_v20 = vsel %vm1855_vm3, %v1832_v17, %v1854_v12  ;;  %v1836_v23 = vrot.slane %v1798_v19, %v2823_v57 }
 0x939   :  { %v1801_v18 = vpop.xlane.xlu1 %1800 }
 0x93a   :  { %v1858_v26 = vsel %vm1857_vm4, %v1836_v23, %v1856_v20  ;;  %v1840_v56 = vrot.slane %v1801_v18, %v2823_v57 }
 0x93b   :  { %v1804_v27 = vpop.xlane.xlu0 %1803 }
 0x93c   :  { %v1860_v28 = vsel %vm1859_vm5, %v1840_v56, %v1858_v26  ;;  %v1844_v29 = vrot.slane %v1804_v27, %v2823_v57 }
 0x93d   :  { %v1807_v21 = vpop.xlane.xlu1 %1806 }
 0x93e   :  { %v1862_v30 = vsel %vm1861_vm6, %v1844_v29, %v1860_v28  ;;  %v1848_v10 = vrot.slane %v1807_v21, %v2823_v57 }
 0x93f   :  { %v1810_v31 = vpop.xlane.xlu0 %1809 }
 0x940   :  { %v1864_v32 = vsel %vm1863_vm7, %v1848_v10, %v1862_v30  ;;  %v1852_v33 = vrot.slane %v1810_v31, %v2823_v57 }
 0x942   :  { %v1866_v34 = vsel %vm1865_vm8, %v1852_v33, %v1864_v32 }
 0x943   :  { %1869 = vst.msk [vmem:[%s2858_s6] sm:$0xff] %vm1868_vm9, %v1866_v34 }

</bundles_post_ra>
